<compile_context>
chip_gen: v5e
topology: v5e:2x2
jax: 0.10.0
libtpu: 0.0.40
codegen_flags: <defaults>
</compile_context>

<pallas_src>
import jax
import jax.numpy as jnp
from jax.experimental import pallas as pl
from jax.experimental.pallas import tpu as pltpu

NEG_SLOPE = 0.01  # PyTorch F.leaky_relu default

# ---------------------------------------------------------------------------
# Static geometry of the dilated lane layouts.
# ---------------------------------------------------------------------------
RS1 = 28                      # conv1 row stride (== input width)
L1 = 25 * RS1 + 25 + 1        # 726: conv1 slab width, valid (i,j<=25) at lane 28i+j
P1 = L1 - RS1 - 1             # 697: pool1 max slab, valid pooled at lane 56i+2j
L2 = 56 * 9 + 2 * 9 + 1       # 523: conv2 slab width, valid at lane 56i+2j
P2 = L2 - 58                  # 465: pool2 max slab, valid pooled at lane 112p+4q
L3 = 112 * 2 + 4 * 2 + 1      # 233: conv3 slab width, valid at lane 112y+4z


def _leaky(v):
    return jnp.where(v >= 0, v, NEG_SLOPE * v)


# ---------------------------------------------------------------------------
# The fused kernel
# ---------------------------------------------------------------------------
def _cnnadv_kernel(x_ref,                       # (1, 784)
                   w1_ref, b1_ref,              # (6, 9),    (6, 1)
                   w2_ref, b2_ref,              # (12, 54),  (12, 1)
                   w3_ref, b3_ref,              # (8, 108),  (8, 1)
                   wf1_ref, bf1_ref,            # (72, 128), (1, 128)
                   wf2_ref, bf2_ref,            # (128,128), (1, 128)
                   wf3_ref, bf3_ref,            # (128, 10), (1, 10)
                   out_ref,                     # (1, 10)
                   im2_ref,                     # (54, 523)  conv2 im2col slab
                   im3_ref,                     # (108, 233) conv3 im2col slab
                   a3c_ref,                     # (8, 9)     conv3 valid values
                   aflat_ref):                  # (1, 72)    flattened fc1 input
    # ---- conv1: 1x28x28 -> 6x26x26 (lane 28i+j).  Cin=1 -> pure VPU. ----
    x = x_ref[...]                               # (1, 784), load once
    w1 = w1_ref[...]                             # (6, 9)
    acc = None
    for kh in range(3):
        for kw in range(3):
            k = kh * 3 + kw
            s = kh * RS1 + kw
            term = w1[:, k:k + 1] * x[:, s:s + L1]        # (6,1)*(1,726)
            acc = term if acc is None else acc + term
    a1 = _leaky(acc + b1_ref[...])               # (6, 726)

    # ---- pool1: 2x2 max, kept dilated (valid pooled at lane 56i+2j) ----
    m1 = jnp.maximum(jnp.maximum(a1[:, 0:P1], a1[:, 1:P1 + 1]),
                     jnp.maximum(a1[:, RS1:RS1 + P1], a1[:, RS1 + 1:RS1 + 1 + P1]))

    # ---- conv2: im2col slab + ONE MXU dot, directly on the dilated slab ----
    for kh in range(3):
        for kw in range(3):
            k = kh * 3 + kw
            off = 56 * kh + 2 * kw               # dilated tap shift
            im2_ref[pl.ds(k * 6, 6), :] = m1[:, off:off + L2]
    a2 = _leaky(jnp.dot(w2_ref[...], im2_ref[...],
                        preferred_element_type=jnp.float32) + b2_ref[...])  # (12, 523)

    # ---- pool2: 2x2 max on the dilated conv2 slab (valid at lane 112p+4q) ----
    m2 = jnp.maximum(jnp.maximum(a2[:, 0:P2], a2[:, 2:P2 + 2]),
                     jnp.maximum(a2[:, 56:56 + P2], a2[:, 58:58 + P2]))

    # ---- conv3: im2col slab + ONE MXU dot ----
    for kh in range(3):
        for kw in range(3):
            k = kh * 3 + kw
            off = 112 * kh + 4 * kw
            im3_ref[pl.ds(k * 12, 12), :] = m2[:, off:off + L3]
    c3 = _leaky(jnp.dot(w3_ref[...], im3_ref[...],
                        preferred_element_type=jnp.float32) + b3_ref[...])   # (8, 233)

    # ---- flatten: pick the 9 valid lanes per channel, channels -> lanes ----
    for y in range(3):
        for z in range(3):
            col = 112 * y + 4 * z
            a3c_ref[:, pl.ds(3 * y + z, 1)] = c3[:, col:col + 1]   # (8,1)
    for c in range(8):
        aflat_ref[:, pl.ds(c * 9, 9)] = a3c_ref[pl.ds(c, 1), :]    # (1,9)

    # ---- fc1 / fc2 / fc3 : three single MXU passes ----
    y1 = _leaky(jnp.dot(aflat_ref[...], wf1_ref[...],
                        preferred_element_type=jnp.float32) + bf1_ref[...])
    y2 = _leaky(jnp.dot(y1, wf2_ref[...],
                        preferred_element_type=jnp.float32) + bf2_ref[...])
    out_ref[...] = (jnp.dot(y2, wf3_ref[...],
                            preferred_element_type=jnp.float32) + bf3_ref[...])


_NUM_INPUTS = 13
_VMEM_SPEC = pl.BlockSpec(memory_space=pltpu.MemorySpace.VMEM)


@jax.jit
def cnnadv_forward(prepped, x):
    """Single-sample forward; x has 784 elements (module views it as (1,28,28))."""
    x_flat = x.reshape(1, 28 * 28).astype(jnp.float32)
    return pl.pallas_call(
        _cnnadv_kernel,
        out_shape=jax.ShapeDtypeStruct((1, 10), jnp.float32),
        in_specs=[_VMEM_SPEC] * _NUM_INPUTS,
        out_specs=_VMEM_SPEC,
        scratch_shapes=[
            pltpu.VMEM((54, L2), jnp.float32),    # conv2 im2col
            pltpu.VMEM((108, L3), jnp.float32),   # conv3 im2col
            pltpu.VMEM((8, 9), jnp.float32),      # conv3 valid values
            pltpu.VMEM((1, 72), jnp.float32),     # flattened fc1 input
        ],
    )(x_flat,
      prepped["w1"], prepped["b1"],
      prepped["w2"], prepped["b2"],
      prepped["w3"], prepped["b3"],
      prepped["wf1"], prepped["bf1"],
      prepped["wf2"], prepped["bf2"],
      prepped["wf3"], prepped["bf3"])


# ---------------------------------------------------------------------------
# Parameters: PyTorch-layout init + one-time TPU-friendly repacking
# ---------------------------------------------------------------------------
def init_params(key):
    ks = jax.random.split(key, 12)

    def w(k, shape, scale=0.1):
        return jax.random.normal(k, shape, jnp.float32) * scale

    return {
        "conv1_w": w(ks[0], (6, 1, 3, 3)),    "conv1_b": w(ks[1], (6,)),
        "conv2_w": w(ks[2], (12, 6, 3, 3)),   "conv2_b": w(ks[3], (12,)),
        "conv3_w": w(ks[4], (8, 12, 3, 3)),   "conv3_b": w(ks[5], (8,)),
        "fc1_w":   w(ks[6], (128, 8 * 3 * 3)), "fc1_b": w(ks[7], (128,)),
        "fc2_w":   w(ks[8], (128, 128)),       "fc2_b": w(ks[9], (128,)),
        "fc3_w":   w(ks[10], (10, 128)),       "fc3_b": w(ks[11], (10,)),
    }


def prepare_params(params):
    """One-time host-side repacking into kernel-friendly layouts (f32)."""
    def pack_conv(w):
        co, ci, kh, kw = w.shape
        # column index = (kh*3 + kw) * Cin + ci  (matches the im2col row order)
        return jnp.transpose(w, (0, 2, 3, 1)).reshape(co, kh * kw * ci).astype(jnp.float32)

    return {
        "w1": pack_conv(params["conv1_w"]),
        "b1": params["conv1_b"].reshape(6, 1).astype(jnp.float32),
        "w2": pack_conv(params["conv2_w"]),
        "b2": params["conv2_b"].reshape(12, 1).astype(jnp.float32),
        "w3": pack_conv(params["conv3_w"]),
        "b3": params["conv3_b"].reshape(8, 1).astype(jnp.float32),
        # kernel flatten order (c*9 + 3y + z) == PyTorch flatten order, so fc1
        # just needs a transpose.
        "wf1": params["fc1_w"].T.astype(jnp.float32),
        "bf1": params["fc1_b"].reshape(1, 128).astype(jnp.float32),
        "wf2": params["fc2_w"].T.astype(jnp.float32),
        "bf2": params["fc2_b"].reshape(1, 128).astype(jnp.float32),
        "wf3": params["fc3_w"].T.astype(jnp.float32),
        "bf3": params["fc3_b"].reshape(1, 10).astype(jnp.float32),
    }


# ---------------------------------------------------------------------------
# Pure-JAX reference (mirrors CNNadv.forward) for a correctness check
# ---------------------------------------------------------------------------
def reference_forward(params, x):
    hi = jax.lax.Precision.HIGHEST

    def conv(v, w, b):
        y = jax.lax.conv_general_dilated(
            v[None], w, window_strides=(1, 1), padding="VALID",
            dimension_numbers=("NCHW", "OIHW", "NCHW"), precision=hi)[0]
        return y + b[:, None, None]

    def pool(v):
        return jax.lax.reduce_window(v, -jnp.inf, jax.lax.max,
                                     (1, 2, 2), (1, 2, 2), "VALID")

    h = x.reshape(1, 28, 28).astype(jnp.float32)
    h = pool(_leaky(conv(h, params["conv1_w"], params["conv1_b"])))
    h = pool(_leaky(conv(h, params["conv2_w"], params["conv2_b"])))
    h = _leaky(conv(h, params["conv3_w"], params["conv3_b"]))
    h = h.reshape(1, 8 * 3 * 3)
    h = _leaky(jnp.dot(h, params["fc1_w"].T, precision=hi) + params["fc1_b"])
    h = _leaky(jnp.dot(h, params["fc2_w"].T, precision=hi) + params["fc2_b"])
    return jnp.dot(h, params["fc3_w"].T, precision=hi) + params["fc3_b"]


if __name__ == "__main__":
    key = jax.random.PRNGKey(0)
    pkey, xkey = jax.random.split(key)
    params = init_params(pkey)
    prepped = prepare_params(params)
    x = jax.random.normal(xkey, (1, 28, 28), jnp.float32)  # module views input as (1,28,28)

    out = cnnadv_forward(prepped, x)
    out = jax.block_until_ready(out)

    assert out.shape == (1, 10), out.shape
    assert out.dtype == jnp.float32
    assert bool(jnp.all(jnp.isfinite(out)))

    ref = reference_forward(params, x)
    assert bool(jnp.allclose(out, ref, atol=2e-3, rtol=2e-3)), (out, ref)

    print("KERNEL_OK")
</pallas_src>

<mosaic_0001>
module attributes {stable_mosaic.version = 11 : i64} {
  func.func @_cnnadv_kernel(%arg0: memref<1x784xf32, #tpu.memory_space<vmem>>, %arg1: memref<6x9xf32, #tpu.memory_space<vmem>>, %arg2: memref<6x1xf32, #tpu.memory_space<vmem>>, %arg3: memref<12x54xf32, #tpu.memory_space<vmem>>, %arg4: memref<12x1xf32, #tpu.memory_space<vmem>>, %arg5: memref<8x108xf32, #tpu.memory_space<vmem>>, %arg6: memref<8x1xf32, #tpu.memory_space<vmem>>, %arg7: memref<72x128xf32, #tpu.memory_space<vmem>>, %arg8: memref<1x128xf32, #tpu.memory_space<vmem>>, %arg9: memref<128x128xf32, #tpu.memory_space<vmem>>, %arg10: memref<1x128xf32, #tpu.memory_space<vmem>>, %arg11: memref<128x10xf32, #tpu.memory_space<vmem>>, %arg12: memref<1x10xf32, #tpu.memory_space<vmem>>, %arg13: memref<1x10xf32, #tpu.memory_space<vmem>>, %arg14: memref<54x523xf32, #tpu.memory_space<vmem>>, %arg15: memref<108x233xf32, #tpu.memory_space<vmem>>, %arg16: memref<8x9xf32, #tpu.memory_space<vmem>>, %arg17: memref<1x72xf32, #tpu.memory_space<vmem>>) attributes {dimension_semantics = [], scalar_prefetch = 0 : i64, scratch_operands = 4 : i64, tpu.core_type = #tpu.core_type<tc>} {
    %c0 = arith.constant 0 : index
    %c0_0 = arith.constant 0 : index
    %0 = vector.load %arg0[%c0, %c0_0] : memref<1x784xf32, #tpu.memory_space<vmem>>, vector<1x784xf32>
    %c0_1 = arith.constant 0 : index
    %c0_2 = arith.constant 0 : index
    %1 = vector.load %arg1[%c0_1, %c0_2] : memref<6x9xf32, #tpu.memory_space<vmem>>, vector<6x9xf32>
    %2 = vector.extract_strided_slice %1 {offsets = [0, 0], sizes = [6, 1], strides = [1, 1]} : vector<6x9xf32> to vector<6x1xf32>
    %3 = vector.extract_strided_slice %0 {offsets = [0, 0], sizes = [1, 726], strides = [1, 1]} : vector<1x784xf32> to vector<1x726xf32>
    %4 = vector.broadcast %2 : vector<6x1xf32> to vector<6x726xf32>
    %5 = vector.broadcast %3 : vector<1x726xf32> to vector<6x726xf32>
    %6 = arith.mulf %4, %5 : vector<6x726xf32>
    %7 = vector.extract_strided_slice %1 {offsets = [0, 1], sizes = [6, 1], strides = [1, 1]} : vector<6x9xf32> to vector<6x1xf32>
    %8 = vector.extract_strided_slice %0 {offsets = [0, 1], sizes = [1, 726], strides = [1, 1]} : vector<1x784xf32> to vector<1x726xf32>
    %9 = vector.broadcast %7 : vector<6x1xf32> to vector<6x726xf32>
    %10 = vector.broadcast %8 : vector<1x726xf32> to vector<6x726xf32>
    %11 = arith.mulf %9, %10 : vector<6x726xf32>
    %12 = arith.addf %6, %11 : vector<6x726xf32>
    %13 = vector.extract_strided_slice %1 {offsets = [0, 2], sizes = [6, 1], strides = [1, 1]} : vector<6x9xf32> to vector<6x1xf32>
    %14 = vector.extract_strided_slice %0 {offsets = [0, 2], sizes = [1, 726], strides = [1, 1]} : vector<1x784xf32> to vector<1x726xf32>
    %15 = vector.broadcast %13 : vector<6x1xf32> to vector<6x726xf32>
    %16 = vector.broadcast %14 : vector<1x726xf32> to vector<6x726xf32>
    %17 = arith.mulf %15, %16 : vector<6x726xf32>
    %18 = arith.addf %12, %17 : vector<6x726xf32>
    %19 = vector.extract_strided_slice %1 {offsets = [0, 3], sizes = [6, 1], strides = [1, 1]} : vector<6x9xf32> to vector<6x1xf32>
    %20 = vector.extract_strided_slice %0 {offsets = [0, 28], sizes = [1, 726], strides = [1, 1]} : vector<1x784xf32> to vector<1x726xf32>
    %21 = vector.broadcast %19 : vector<6x1xf32> to vector<6x726xf32>
    %22 = vector.broadcast %20 : vector<1x726xf32> to vector<6x726xf32>
    %23 = arith.mulf %21, %22 : vector<6x726xf32>
    %24 = arith.addf %18, %23 : vector<6x726xf32>
    %25 = vector.extract_strided_slice %1 {offsets = [0, 4], sizes = [6, 1], strides = [1, 1]} : vector<6x9xf32> to vector<6x1xf32>
    %26 = vector.extract_strided_slice %0 {offsets = [0, 29], sizes = [1, 726], strides = [1, 1]} : vector<1x784xf32> to vector<1x726xf32>
    %27 = vector.broadcast %25 : vector<6x1xf32> to vector<6x726xf32>
    %28 = vector.broadcast %26 : vector<1x726xf32> to vector<6x726xf32>
    %29 = arith.mulf %27, %28 : vector<6x726xf32>
    %30 = arith.addf %24, %29 : vector<6x726xf32>
    %31 = vector.extract_strided_slice %1 {offsets = [0, 5], sizes = [6, 1], strides = [1, 1]} : vector<6x9xf32> to vector<6x1xf32>
    %32 = vector.extract_strided_slice %0 {offsets = [0, 30], sizes = [1, 726], strides = [1, 1]} : vector<1x784xf32> to vector<1x726xf32>
    %33 = vector.broadcast %31 : vector<6x1xf32> to vector<6x726xf32>
    %34 = vector.broadcast %32 : vector<1x726xf32> to vector<6x726xf32>
    %35 = arith.mulf %33, %34 : vector<6x726xf32>
    %36 = arith.addf %30, %35 : vector<6x726xf32>
    %37 = vector.extract_strided_slice %1 {offsets = [0, 6], sizes = [6, 1], strides = [1, 1]} : vector<6x9xf32> to vector<6x1xf32>
    %38 = vector.extract_strided_slice %0 {offsets = [0, 56], sizes = [1, 726], strides = [1, 1]} : vector<1x784xf32> to vector<1x726xf32>
    %39 = vector.broadcast %37 : vector<6x1xf32> to vector<6x726xf32>
    %40 = vector.broadcast %38 : vector<1x726xf32> to vector<6x726xf32>
    %41 = arith.mulf %39, %40 : vector<6x726xf32>
    %42 = arith.addf %36, %41 : vector<6x726xf32>
    %43 = vector.extract_strided_slice %1 {offsets = [0, 7], sizes = [6, 1], strides = [1, 1]} : vector<6x9xf32> to vector<6x1xf32>
    %44 = vector.extract_strided_slice %0 {offsets = [0, 57], sizes = [1, 726], strides = [1, 1]} : vector<1x784xf32> to vector<1x726xf32>
    %45 = vector.broadcast %43 : vector<6x1xf32> to vector<6x726xf32>
    %46 = vector.broadcast %44 : vector<1x726xf32> to vector<6x726xf32>
    %47 = arith.mulf %45, %46 : vector<6x726xf32>
    %48 = arith.addf %42, %47 : vector<6x726xf32>
    %49 = vector.extract_strided_slice %1 {offsets = [0, 8], sizes = [6, 1], strides = [1, 1]} : vector<6x9xf32> to vector<6x1xf32>
    %50 = vector.extract_strided_slice %0 {offsets = [0, 58], sizes = [1, 726], strides = [1, 1]} : vector<1x784xf32> to vector<1x726xf32>
    %51 = vector.broadcast %49 : vector<6x1xf32> to vector<6x726xf32>
    %52 = vector.broadcast %50 : vector<1x726xf32> to vector<6x726xf32>
    %53 = arith.mulf %51, %52 : vector<6x726xf32>
    %54 = arith.addf %48, %53 : vector<6x726xf32>
    %c0_3 = arith.constant 0 : index
    %c0_4 = arith.constant 0 : index
    %55 = vector.load %arg2[%c0_3, %c0_4] : memref<6x1xf32, #tpu.memory_space<vmem>>, vector<6x1xf32>
    %56 = vector.broadcast %55 : vector<6x1xf32> to vector<6x726xf32>
    %57 = arith.addf %54, %56 : vector<6x726xf32>
    %cst = arith.constant 0.000000e+00 : f32
    %58 = vector.broadcast %cst : f32 to vector<6x726xf32>
    %59 = arith.cmpf oge, %57, %58 : vector<6x726xf32>
    %cst_5 = arith.constant 0.00999999977 : f32
    %60 = vector.broadcast %cst_5 : f32 to vector<6x726xf32>
    %61 = arith.mulf %60, %57 : vector<6x726xf32>
    %62 = arith.select %59, %57, %61 : vector<6x726xi1>, vector<6x726xf32>
    %63 = vector.extract_strided_slice %62 {offsets = [0, 0], sizes = [6, 697], strides = [1, 1]} : vector<6x726xf32> to vector<6x697xf32>
    %64 = vector.extract_strided_slice %62 {offsets = [0, 1], sizes = [6, 697], strides = [1, 1]} : vector<6x726xf32> to vector<6x697xf32>
    %65 = arith.maximumf %63, %64 : vector<6x697xf32>
    %66 = vector.extract_strided_slice %62 {offsets = [0, 28], sizes = [6, 697], strides = [1, 1]} : vector<6x726xf32> to vector<6x697xf32>
    %67 = vector.extract_strided_slice %62 {offsets = [0, 29], sizes = [6, 697], strides = [1, 1]} : vector<6x726xf32> to vector<6x697xf32>
    %68 = arith.maximumf %66, %67 : vector<6x697xf32>
    %69 = arith.maximumf %65, %68 : vector<6x697xf32>
    %70 = vector.extract_strided_slice %69 {offsets = [0, 0], sizes = [6, 523], strides = [1, 1]} : vector<6x697xf32> to vector<6x523xf32>
    %c0_6 = arith.constant 0 : index
    %c0_7 = arith.constant 0 : index
    %71 = vector.load %arg14[%c0_6, %c0_7] : memref<54x523xf32, #tpu.memory_space<vmem>>, vector<6x523xf32>
    tpu.vector_store %arg14[%c0_6, %c0_7], %70 {strides = array<i32>} : memref<54x523xf32, #tpu.memory_space<vmem>>, vector<6x523xf32>,
    %72 = vector.extract_strided_slice %69 {offsets = [0, 2], sizes = [6, 523], strides = [1, 1]} : vector<6x697xf32> to vector<6x523xf32>
    %c6 = arith.constant 6 : index
    %c0_8 = arith.constant 0 : index
    %73 = vector.load %arg14[%c6, %c0_8] : memref<54x523xf32, #tpu.memory_space<vmem>>, vector<6x523xf32>
    tpu.vector_store %arg14[%c6, %c0_8], %72 {strides = array<i32>} : memref<54x523xf32, #tpu.memory_space<vmem>>, vector<6x523xf32>,
    %74 = vector.extract_strided_slice %69 {offsets = [0, 4], sizes = [6, 523], strides = [1, 1]} : vector<6x697xf32> to vector<6x523xf32>
    %c12 = arith.constant 12 : index
    %c0_9 = arith.constant 0 : index
    %75 = vector.load %arg14[%c12, %c0_9] : memref<54x523xf32, #tpu.memory_space<vmem>>, vector<6x523xf32>
    tpu.vector_store %arg14[%c12, %c0_9], %74 {strides = array<i32>} : memref<54x523xf32, #tpu.memory_space<vmem>>, vector<6x523xf32>,
    %76 = vector.extract_strided_slice %69 {offsets = [0, 56], sizes = [6, 523], strides = [1, 1]} : vector<6x697xf32> to vector<6x523xf32>
    %c18 = arith.constant 18 : index
    %c0_10 = arith.constant 0 : index
    %77 = vector.load %arg14[%c18, %c0_10] : memref<54x523xf32, #tpu.memory_space<vmem>>, vector<6x523xf32>
    tpu.vector_store %arg14[%c18, %c0_10], %76 {strides = array<i32>} : memref<54x523xf32, #tpu.memory_space<vmem>>, vector<6x523xf32>,
    %78 = vector.extract_strided_slice %69 {offsets = [0, 58], sizes = [6, 523], strides = [1, 1]} : vector<6x697xf32> to vector<6x523xf32>
    %c24 = arith.constant 24 : index
    %c0_11 = arith.constant 0 : index
    %79 = vector.load %arg14[%c24, %c0_11] : memref<54x523xf32, #tpu.memory_space<vmem>>, vector<6x523xf32>
    tpu.vector_store %arg14[%c24, %c0_11], %78 {strides = array<i32>} : memref<54x523xf32, #tpu.memory_space<vmem>>, vector<6x523xf32>,
    %80 = vector.extract_strided_slice %69 {offsets = [0, 60], sizes = [6, 523], strides = [1, 1]} : vector<6x697xf32> to vector<6x523xf32>
    %c30 = arith.constant 30 : index
    %c0_12 = arith.constant 0 : index
    %81 = vector.load %arg14[%c30, %c0_12] : memref<54x523xf32, #tpu.memory_space<vmem>>, vector<6x523xf32>
    tpu.vector_store %arg14[%c30, %c0_12], %80 {strides = array<i32>} : memref<54x523xf32, #tpu.memory_space<vmem>>, vector<6x523xf32>,
    %82 = vector.extract_strided_slice %69 {offsets = [0, 112], sizes = [6, 523], strides = [1, 1]} : vector<6x697xf32> to vector<6x523xf32>
    %c36 = arith.constant 36 : index
    %c0_13 = arith.constant 0 : index
    %83 = vector.load %arg14[%c36, %c0_13] : memref<54x523xf32, #tpu.memory_space<vmem>>, vector<6x523xf32>
    tpu.vector_store %arg14[%c36, %c0_13], %82 {strides = array<i32>} : memref<54x523xf32, #tpu.memory_space<vmem>>, vector<6x523xf32>,
    %84 = vector.extract_strided_slice %69 {offsets = [0, 114], sizes = [6, 523], strides = [1, 1]} : vector<6x697xf32> to vector<6x523xf32>
    %c42 = arith.constant 42 : index
    %c0_14 = arith.constant 0 : index
    %85 = vector.load %arg14[%c42, %c0_14] : memref<54x523xf32, #tpu.memory_space<vmem>>, vector<6x523xf32>
    tpu.vector_store %arg14[%c42, %c0_14], %84 {strides = array<i32>} : memref<54x523xf32, #tpu.memory_space<vmem>>, vector<6x523xf32>,
    %86 = vector.extract_strided_slice %69 {offsets = [0, 116], sizes = [6, 523], strides = [1, 1]} : vector<6x697xf32> to vector<6x523xf32>
    %c48 = arith.constant 48 : index
    %c0_15 = arith.constant 0 : index
    %87 = vector.load %arg14[%c48, %c0_15] : memref<54x523xf32, #tpu.memory_space<vmem>>, vector<6x523xf32>
    tpu.vector_store %arg14[%c48, %c0_15], %86 {strides = array<i32>} : memref<54x523xf32, #tpu.memory_space<vmem>>, vector<6x523xf32>,
    %c0_16 = arith.constant 0 : index
    %c0_17 = arith.constant 0 : index
    %88 = vector.load %arg3[%c0_16, %c0_17] : memref<12x54xf32, #tpu.memory_space<vmem>>, vector<12x54xf32>
    %c0_18 = arith.constant 0 : index
    %c0_19 = arith.constant 0 : index
    %89 = vector.load %arg14[%c0_18, %c0_19] : memref<54x523xf32, #tpu.memory_space<vmem>>, vector<54x523xf32>
    %cst_20 = arith.constant dense<0.000000e+00> : vector<12x523xf32>
    %90 = tpu.matmul %88, %89, %cst_20 {dimension_numbers = #tpu.dot_dimension_numbers<[1], [0], [0], [1], [0, 0, 1, 1], [], []>} : vector<12x54xf32>, vector<54x523xf32>, vector<12x523xf32> -> vector<12x523xf32>
    %c0_21 = arith.constant 0 : index
    %c0_22 = arith.constant 0 : index
    %91 = vector.load %arg4[%c0_21, %c0_22] : memref<12x1xf32, #tpu.memory_space<vmem>>, vector<12x1xf32>
    %92 = vector.broadcast %91 : vector<12x1xf32> to vector<12x523xf32>
    %93 = arith.addf %90, %92 : vector<12x523xf32>
    %cst_23 = arith.constant 0.000000e+00 : f32
    %94 = vector.broadcast %cst_23 : f32 to vector<12x523xf32>
    %95 = arith.cmpf oge, %93, %94 : vector<12x523xf32>
    %cst_24 = arith.constant 0.00999999977 : f32
    %96 = vector.broadcast %cst_24 : f32 to vector<12x523xf32>
    %97 = arith.mulf %96, %93 : vector<12x523xf32>
    %98 = arith.select %95, %93, %97 : vector<12x523xi1>, vector<12x523xf32>
    %99 = vector.extract_strided_slice %98 {offsets = [0, 0], sizes = [12, 465], strides = [1, 1]} : vector<12x523xf32> to vector<12x465xf32>
    %100 = vector.extract_strided_slice %98 {offsets = [0, 2], sizes = [12, 465], strides = [1, 1]} : vector<12x523xf32> to vector<12x465xf32>
    %101 = arith.maximumf %99, %100 : vector<12x465xf32>
    %102 = vector.extract_strided_slice %98 {offsets = [0, 56], sizes = [12, 465], strides = [1, 1]} : vector<12x523xf32> to vector<12x465xf32>
    %103 = vector.extract_strided_slice %98 {offsets = [0, 58], sizes = [12, 465], strides = [1, 1]} : vector<12x523xf32> to vector<12x465xf32>
    %104 = arith.maximumf %102, %103 : vector<12x465xf32>
    %105 = arith.maximumf %101, %104 : vector<12x465xf32>
    %106 = vector.extract_strided_slice %105 {offsets = [0, 0], sizes = [12, 233], strides = [1, 1]} : vector<12x465xf32> to vector<12x233xf32>
    %c0_25 = arith.constant 0 : index
    %c0_26 = arith.constant 0 : index
    %107 = vector.load %arg15[%c0_25, %c0_26] : memref<108x233xf32, #tpu.memory_space<vmem>>, vector<12x233xf32>
    tpu.vector_store %arg15[%c0_25, %c0_26], %106 {strides = array<i32>} : memref<108x233xf32, #tpu.memory_space<vmem>>, vector<12x233xf32>,
    %108 = vector.extract_strided_slice %105 {offsets = [0, 4], sizes = [12, 233], strides = [1, 1]} : vector<12x465xf32> to vector<12x233xf32>
    %c12_27 = arith.constant 12 : index
    %c0_28 = arith.constant 0 : index
    %109 = vector.load %arg15[%c12_27, %c0_28] : memref<108x233xf32, #tpu.memory_space<vmem>>, vector<12x233xf32>
    tpu.vector_store %arg15[%c12_27, %c0_28], %108 {strides = array<i32>} : memref<108x233xf32, #tpu.memory_space<vmem>>, vector<12x233xf32>,
    %110 = vector.extract_strided_slice %105 {offsets = [0, 8], sizes = [12, 233], strides = [1, 1]} : vector<12x465xf32> to vector<12x233xf32>
    %c24_29 = arith.constant 24 : index
    %c0_30 = arith.constant 0 : index
    %111 = vector.load %arg15[%c24_29, %c0_30] : memref<108x233xf32, #tpu.memory_space<vmem>>, vector<12x233xf32>
    tpu.vector_store %arg15[%c24_29, %c0_30], %110 {strides = array<i32>} : memref<108x233xf32, #tpu.memory_space<vmem>>, vector<12x233xf32>,
    %112 = vector.extract_strided_slice %105 {offsets = [0, 112], sizes = [12, 233], strides = [1, 1]} : vector<12x465xf32> to vector<12x233xf32>
    %c36_31 = arith.constant 36 : index
    %c0_32 = arith.constant 0 : index
    %113 = vector.load %arg15[%c36_31, %c0_32] : memref<108x233xf32, #tpu.memory_space<vmem>>, vector<12x233xf32>
    tpu.vector_store %arg15[%c36_31, %c0_32], %112 {strides = array<i32>} : memref<108x233xf32, #tpu.memory_space<vmem>>, vector<12x233xf32>,
    %114 = vector.extract_strided_slice %105 {offsets = [0, 116], sizes = [12, 233], strides = [1, 1]} : vector<12x465xf32> to vector<12x233xf32>
    %c48_33 = arith.constant 48 : index
    %c0_34 = arith.constant 0 : index
    %115 = vector.load %arg15[%c48_33, %c0_34] : memref<108x233xf32, #tpu.memory_space<vmem>>, vector<12x233xf32>
    tpu.vector_store %arg15[%c48_33, %c0_34], %114 {strides = array<i32>} : memref<108x233xf32, #tpu.memory_space<vmem>>, vector<12x233xf32>,
    %116 = vector.extract_strided_slice %105 {offsets = [0, 120], sizes = [12, 233], strides = [1, 1]} : vector<12x465xf32> to vector<12x233xf32>
    %c60 = arith.constant 60 : index
    %c0_35 = arith.constant 0 : index
    %117 = vector.load %arg15[%c60, %c0_35] : memref<108x233xf32, #tpu.memory_space<vmem>>, vector<12x233xf32>
    tpu.vector_store %arg15[%c60, %c0_35], %116 {strides = array<i32>} : memref<108x233xf32, #tpu.memory_space<vmem>>, vector<12x233xf32>,
    %118 = vector.extract_strided_slice %105 {offsets = [0, 224], sizes = [12, 233], strides = [1, 1]} : vector<12x465xf32> to vector<12x233xf32>
    %c72 = arith.constant 72 : index
    %c0_36 = arith.constant 0 : index
    %119 = vector.load %arg15[%c72, %c0_36] : memref<108x233xf32, #tpu.memory_space<vmem>>, vector<12x233xf32>
    tpu.vector_store %arg15[%c72, %c0_36], %118 {strides = array<i32>} : memref<108x233xf32, #tpu.memory_space<vmem>>, vector<12x233xf32>,
    %120 = vector.extract_strided_slice %105 {offsets = [0, 228], sizes = [12, 233], strides = [1, 1]} : vector<12x465xf32> to vector<12x233xf32>
    %c84 = arith.constant 84 : index
    %c0_37 = arith.constant 0 : index
    %121 = vector.load %arg15[%c84, %c0_37] : memref<108x233xf32, #tpu.memory_space<vmem>>, vector<12x233xf32>
    tpu.vector_store %arg15[%c84, %c0_37], %120 {strides = array<i32>} : memref<108x233xf32, #tpu.memory_space<vmem>>, vector<12x233xf32>,
    %122 = vector.extract_strided_slice %105 {offsets = [0, 232], sizes = [12, 233], strides = [1, 1]} : vector<12x465xf32> to vector<12x233xf32>
    %c96 = arith.constant 96 : index
    %c0_38 = arith.constant 0 : index
    %123 = vector.load %arg15[%c96, %c0_38] : memref<108x233xf32, #tpu.memory_space<vmem>>, vector<12x233xf32>
    tpu.vector_store %arg15[%c96, %c0_38], %122 {strides = array<i32>} : memref<108x233xf32, #tpu.memory_space<vmem>>, vector<12x233xf32>,
    %c0_39 = arith.constant 0 : index
    %c0_40 = arith.constant 0 : index
    %124 = vector.load %arg5[%c0_39, %c0_40] : memref<8x108xf32, #tpu.memory_space<vmem>>, vector<8x108xf32>
    %c0_41 = arith.constant 0 : index
    %c0_42 = arith.constant 0 : index
    %125 = vector.load %arg15[%c0_41, %c0_42] : memref<108x233xf32, #tpu.memory_space<vmem>>, vector<108x233xf32>
    %cst_43 = arith.constant dense<0.000000e+00> : vector<8x233xf32>
    %126 = tpu.matmul %124, %125, %cst_43 {dimension_numbers = #tpu.dot_dimension_numbers<[1], [0], [0], [1], [0, 0, 1, 1], [], []>} : vector<8x108xf32>, vector<108x233xf32>, vector<8x233xf32> -> vector<8x233xf32>
    %c0_44 = arith.constant 0 : index
    %c0_45 = arith.constant 0 : index
    %127 = vector.load %arg6[%c0_44, %c0_45] : memref<8x1xf32, #tpu.memory_space<vmem>>, vector<8x1xf32>
    %128 = vector.broadcast %127 : vector<8x1xf32> to vector<8x233xf32>
    %129 = arith.addf %126, %128 : vector<8x233xf32>
    %cst_46 = arith.constant 0.000000e+00 : f32
    %130 = vector.broadcast %cst_46 : f32 to vector<8x233xf32>
    %131 = arith.cmpf oge, %129, %130 : vector<8x233xf32>
    %cst_47 = arith.constant 0.00999999977 : f32
    %132 = vector.broadcast %cst_47 : f32 to vector<8x233xf32>
    %133 = arith.mulf %132, %129 : vector<8x233xf32>
    %134 = arith.select %131, %129, %133 : vector<8x233xi1>, vector<8x233xf32>
    %135 = vector.extract_strided_slice %134 {offsets = [0, 0], sizes = [8, 1], strides = [1, 1]} : vector<8x233xf32> to vector<8x1xf32>
    %c0_48 = arith.constant 0 : index
    %c0_49 = arith.constant 0 : index
    %136 = vector.load %arg16[%c0_48, %c0_49] : memref<8x9xf32, #tpu.memory_space<vmem>>, vector<8x1xf32>
    tpu.vector_store %arg16[%c0_48, %c0_49], %135 {strides = array<i32>} : memref<8x9xf32, #tpu.memory_space<vmem>>, vector<8x1xf32>,
    %137 = vector.extract_strided_slice %134 {offsets = [0, 4], sizes = [8, 1], strides = [1, 1]} : vector<8x233xf32> to vector<8x1xf32>
    %c0_50 = arith.constant 0 : index
    %c1 = arith.constant 1 : index
    %138 = vector.load %arg16[%c0_50, %c1] : memref<8x9xf32, #tpu.memory_space<vmem>>, vector<8x1xf32>
    tpu.vector_store %arg16[%c0_50, %c1], %137 {strides = array<i32>} : memref<8x9xf32, #tpu.memory_space<vmem>>, vector<8x1xf32>,
    %139 = vector.extract_strided_slice %134 {offsets = [0, 8], sizes = [8, 1], strides = [1, 1]} : vector<8x233xf32> to vector<8x1xf32>
    %c0_51 = arith.constant 0 : index
    %c2 = arith.constant 2 : index
    %140 = vector.load %arg16[%c0_51, %c2] : memref<8x9xf32, #tpu.memory_space<vmem>>, vector<8x1xf32>
    tpu.vector_store %arg16[%c0_51, %c2], %139 {strides = array<i32>} : memref<8x9xf32, #tpu.memory_space<vmem>>, vector<8x1xf32>,
    %141 = vector.extract_strided_slice %134 {offsets = [0, 112], sizes = [8, 1], strides = [1, 1]} : vector<8x233xf32> to vector<8x1xf32>
    %c0_52 = arith.constant 0 : index
    %c3 = arith.constant 3 : index
    %142 = vector.load %arg16[%c0_52, %c3] : memref<8x9xf32, #tpu.memory_space<vmem>>, vector<8x1xf32>
    tpu.vector_store %arg16[%c0_52, %c3], %141 {strides = array<i32>} : memref<8x9xf32, #tpu.memory_space<vmem>>, vector<8x1xf32>,
    %143 = vector.extract_strided_slice %134 {offsets = [0, 116], sizes = [8, 1], strides = [1, 1]} : vector<8x233xf32> to vector<8x1xf32>
    %c0_53 = arith.constant 0 : index
    %c4 = arith.constant 4 : index
    %144 = vector.load %arg16[%c0_53, %c4] : memref<8x9xf32, #tpu.memory_space<vmem>>, vector<8x1xf32>
    tpu.vector_store %arg16[%c0_53, %c4], %143 {strides = array<i32>} : memref<8x9xf32, #tpu.memory_space<vmem>>, vector<8x1xf32>,
    %145 = vector.extract_strided_slice %134 {offsets = [0, 120], sizes = [8, 1], strides = [1, 1]} : vector<8x233xf32> to vector<8x1xf32>
    %c0_54 = arith.constant 0 : index
    %c5 = arith.constant 5 : index
    %146 = vector.load %arg16[%c0_54, %c5] : memref<8x9xf32, #tpu.memory_space<vmem>>, vector<8x1xf32>
    tpu.vector_store %arg16[%c0_54, %c5], %145 {strides = array<i32>} : memref<8x9xf32, #tpu.memory_space<vmem>>, vector<8x1xf32>,
    %147 = vector.extract_strided_slice %134 {offsets = [0, 224], sizes = [8, 1], strides = [1, 1]} : vector<8x233xf32> to vector<8x1xf32>
    %c0_55 = arith.constant 0 : index
    %c6_56 = arith.constant 6 : index
    %148 = vector.load %arg16[%c0_55, %c6_56] : memref<8x9xf32, #tpu.memory_space<vmem>>, vector<8x1xf32>
    tpu.vector_store %arg16[%c0_55, %c6_56], %147 {strides = array<i32>} : memref<8x9xf32, #tpu.memory_space<vmem>>, vector<8x1xf32>,
    %149 = vector.extract_strided_slice %134 {offsets = [0, 228], sizes = [8, 1], strides = [1, 1]} : vector<8x233xf32> to vector<8x1xf32>
    %c0_57 = arith.constant 0 : index
    %c7 = arith.constant 7 : index
    %150 = vector.load %arg16[%c0_57, %c7] : memref<8x9xf32, #tpu.memory_space<vmem>>, vector<8x1xf32>
    tpu.vector_store %arg16[%c0_57, %c7], %149 {strides = array<i32>} : memref<8x9xf32, #tpu.memory_space<vmem>>, vector<8x1xf32>,
    %151 = vector.extract_strided_slice %134 {offsets = [0, 232], sizes = [8, 1], strides = [1, 1]} : vector<8x233xf32> to vector<8x1xf32>
    %c0_58 = arith.constant 0 : index
    %c8 = arith.constant 8 : index
    %152 = vector.load %arg16[%c0_58, %c8] : memref<8x9xf32, #tpu.memory_space<vmem>>, vector<8x1xf32>
    tpu.vector_store %arg16[%c0_58, %c8], %151 {strides = array<i32>} : memref<8x9xf32, #tpu.memory_space<vmem>>, vector<8x1xf32>,
    %c0_59 = arith.constant 0 : index
    %c0_60 = arith.constant 0 : index
    %153 = vector.load %arg16[%c0_59, %c0_60] : memref<8x9xf32, #tpu.memory_space<vmem>>, vector<1x9xf32>
    %c0_61 = arith.constant 0 : index
    %c0_62 = arith.constant 0 : index
    %154 = vector.load %arg17[%c0_61, %c0_62] : memref<1x72xf32, #tpu.memory_space<vmem>>, vector<1x9xf32>
    tpu.vector_store %arg17[%c0_61, %c0_62], %153 {strides = array<i32>} : memref<1x72xf32, #tpu.memory_space<vmem>>, vector<1x9xf32>,
    %c1_63 = arith.constant 1 : index
    %c0_64 = arith.constant 0 : index
    %155 = vector.load %arg16[%c1_63, %c0_64] : memref<8x9xf32, #tpu.memory_space<vmem>>, vector<1x9xf32>
    %c0_65 = arith.constant 0 : index
    %c9 = arith.constant 9 : index
    %156 = vector.load %arg17[%c0_65, %c9] : memref<1x72xf32, #tpu.memory_space<vmem>>, vector<1x9xf32>
    tpu.vector_store %arg17[%c0_65, %c9], %155 {strides = array<i32>} : memref<1x72xf32, #tpu.memory_space<vmem>>, vector<1x9xf32>,
    %c2_66 = arith.constant 2 : index
    %c0_67 = arith.constant 0 : index
    %157 = vector.load %arg16[%c2_66, %c0_67] : memref<8x9xf32, #tpu.memory_space<vmem>>, vector<1x9xf32>
    %c0_68 = arith.constant 0 : index
    %c18_69 = arith.constant 18 : index
    %158 = vector.load %arg17[%c0_68, %c18_69] : memref<1x72xf32, #tpu.memory_space<vmem>>, vector<1x9xf32>
    tpu.vector_store %arg17[%c0_68, %c18_69], %157 {strides = array<i32>} : memref<1x72xf32, #tpu.memory_space<vmem>>, vector<1x9xf32>,
    %c3_70 = arith.constant 3 : index
    %c0_71 = arith.constant 0 : index
    %159 = vector.load %arg16[%c3_70, %c0_71] : memref<8x9xf32, #tpu.memory_space<vmem>>, vector<1x9xf32>
    %c0_72 = arith.constant 0 : index
    %c27 = arith.constant 27 : index
    %160 = vector.load %arg17[%c0_72, %c27] : memref<1x72xf32, #tpu.memory_space<vmem>>, vector<1x9xf32>
    tpu.vector_store %arg17[%c0_72, %c27], %159 {strides = array<i32>} : memref<1x72xf32, #tpu.memory_space<vmem>>, vector<1x9xf32>,
    %c4_73 = arith.constant 4 : index
    %c0_74 = arith.constant 0 : index
    %161 = vector.load %arg16[%c4_73, %c0_74] : memref<8x9xf32, #tpu.memory_space<vmem>>, vector<1x9xf32>
    %c0_75 = arith.constant 0 : index
    %c36_76 = arith.constant 36 : index
    %162 = vector.load %arg17[%c0_75, %c36_76] : memref<1x72xf32, #tpu.memory_space<vmem>>, vector<1x9xf32>
    tpu.vector_store %arg17[%c0_75, %c36_76], %161 {strides = array<i32>} : memref<1x72xf32, #tpu.memory_space<vmem>>, vector<1x9xf32>,
    %c5_77 = arith.constant 5 : index
    %c0_78 = arith.constant 0 : index
    %163 = vector.load %arg16[%c5_77, %c0_78] : memref<8x9xf32, #tpu.memory_space<vmem>>, vector<1x9xf32>
    %c0_79 = arith.constant 0 : index
    %c45 = arith.constant 45 : index
    %164 = vector.load %arg17[%c0_79, %c45] : memref<1x72xf32, #tpu.memory_space<vmem>>, vector<1x9xf32>
    tpu.vector_store %arg17[%c0_79, %c45], %163 {strides = array<i32>} : memref<1x72xf32, #tpu.memory_space<vmem>>, vector<1x9xf32>,
    %c6_80 = arith.constant 6 : index
    %c0_81 = arith.constant 0 : index
    %165 = vector.load %arg16[%c6_80, %c0_81] : memref<8x9xf32, #tpu.memory_space<vmem>>, vector<1x9xf32>
    %c0_82 = arith.constant 0 : index
    %c54 = arith.constant 54 : index
    %166 = vector.load %arg17[%c0_82, %c54] : memref<1x72xf32, #tpu.memory_space<vmem>>, vector<1x9xf32>
    tpu.vector_store %arg17[%c0_82, %c54], %165 {strides = array<i32>} : memref<1x72xf32, #tpu.memory_space<vmem>>, vector<1x9xf32>,
    %c7_83 = arith.constant 7 : index
    %c0_84 = arith.constant 0 : index
    %167 = vector.load %arg16[%c7_83, %c0_84] : memref<8x9xf32, #tpu.memory_space<vmem>>, vector<1x9xf32>
    %c0_85 = arith.constant 0 : index
    %c63 = arith.constant 63 : index
    %168 = vector.load %arg17[%c0_85, %c63] : memref<1x72xf32, #tpu.memory_space<vmem>>, vector<1x9xf32>
    tpu.vector_store %arg17[%c0_85, %c63], %167 {strides = array<i32>} : memref<1x72xf32, #tpu.memory_space<vmem>>, vector<1x9xf32>,
    %c0_86 = arith.constant 0 : index
    %c0_87 = arith.constant 0 : index
    %169 = vector.load %arg17[%c0_86, %c0_87] : memref<1x72xf32, #tpu.memory_space<vmem>>, vector<1x72xf32>
    %c0_88 = arith.constant 0 : index
    %c0_89 = arith.constant 0 : index
    %170 = vector.load %arg7[%c0_88, %c0_89] : memref<72x128xf32, #tpu.memory_space<vmem>>, vector<72x128xf32>
    %cst_90 = arith.constant dense<0.000000e+00> : vector<1x128xf32>
    %171 = tpu.matmul %169, %170, %cst_90 {dimension_numbers = #tpu.dot_dimension_numbers<[1], [0], [0], [1], [0, 0, 1, 1], [], []>} : vector<1x72xf32>, vector<72x128xf32>, vector<1x128xf32> -> vector<1x128xf32>
    %c0_91 = arith.constant 0 : index
    %c0_92 = arith.constant 0 : index
    %172 = vector.load %arg8[%c0_91, %c0_92] : memref<1x128xf32, #tpu.memory_space<vmem>>, vector<1x128xf32>
    %173 = arith.addf %171, %172 : vector<1x128xf32>
    %cst_93 = arith.constant 0.000000e+00 : f32
    %174 = vector.broadcast %cst_93 : f32 to vector<1x128xf32>
    %175 = arith.cmpf oge, %173, %174 : vector<1x128xf32>
    %cst_94 = arith.constant 0.00999999977 : f32
    %176 = vector.broadcast %cst_94 : f32 to vector<1x128xf32>
    %177 = arith.mulf %176, %173 : vector<1x128xf32>
    %178 = arith.select %175, %173, %177 : vector<1x128xi1>, vector<1x128xf32>
    %c0_95 = arith.constant 0 : index
    %c0_96 = arith.constant 0 : index
    %179 = vector.load %arg9[%c0_95, %c0_96] : memref<128x128xf32, #tpu.memory_space<vmem>>, vector<128x128xf32>
    %cst_97 = arith.constant dense<0.000000e+00> : vector<1x128xf32>
    %180 = tpu.matmul %178, %179, %cst_97 {dimension_numbers = #tpu.dot_dimension_numbers<[1], [0], [0], [1], [0, 0, 1, 1], [], []>} : vector<1x128xf32>, vector<128x128xf32>, vector<1x128xf32> -> vector<1x128xf32>
    %c0_98 = arith.constant 0 : index
    %c0_99 = arith.constant 0 : index
    %181 = vector.load %arg10[%c0_98, %c0_99] : memref<1x128xf32, #tpu.memory_space<vmem>>, vector<1x128xf32>
    %182 = arith.addf %180, %181 : vector<1x128xf32>
    %cst_100 = arith.constant 0.000000e+00 : f32
    %183 = vector.broadcast %cst_100 : f32 to vector<1x128xf32>
    %184 = arith.cmpf oge, %182, %183 : vector<1x128xf32>
    %cst_101 = arith.constant 0.00999999977 : f32
    %185 = vector.broadcast %cst_101 : f32 to vector<1x128xf32>
    %186 = arith.mulf %185, %182 : vector<1x128xf32>
    %187 = arith.select %184, %182, %186 : vector<1x128xi1>, vector<1x128xf32>
    %c0_102 = arith.constant 0 : index
    %c0_103 = arith.constant 0 : index
    %188 = vector.load %arg11[%c0_102, %c0_103] : memref<128x10xf32, #tpu.memory_space<vmem>>, vector<128x10xf32>
    %cst_104 = arith.constant dense<0.000000e+00> : vector<1x10xf32>
    %189 = tpu.matmul %187, %188, %cst_104 {dimension_numbers = #tpu.dot_dimension_numbers<[1], [0], [0], [1], [0, 0, 1, 1], [], []>} : vector<1x128xf32>, vector<128x10xf32>, vector<1x10xf32> -> vector<1x10xf32>
    %c0_105 = arith.constant 0 : index
    %c0_106 = arith.constant 0 : index
    %190 = vector.load %arg12[%c0_105, %c0_106] : memref<1x10xf32, #tpu.memory_space<vmem>>, vector<1x10xf32>
    %191 = arith.addf %189, %190 : vector<1x10xf32>
    %c0_107 = arith.constant 0 : index
    %c0_108 = arith.constant 0 : index
    %192 = vector.load %arg13[%c0_107, %c0_108] : memref<1x10xf32, #tpu.memory_space<vmem>>, vector<1x10xf32>
    tpu.vector_store %arg13[%c0_107, %c0_108], %191 {strides = array<i32>} : memref<1x10xf32, #tpu.memory_space<vmem>>, vector<1x10xf32>,
    return
  }
}

</mosaic_0001>

<bundles_post_ra>
// kernel: cnnadv_forward.1
= control target key start
LH: loop header
LB: loop body
LE: loop exit
PB: predicated region body
PF: predicated region fallthrough
CT: control target
= control target key end

     0   :  { %v1765_v1 = vmov 1   ;;  %v1766_v2 = vmov 3   ;;  %s2689_s0 = inlined_call_operand.vmem [shape: f32[1,784], index: 0, kind: input, shape index: {}]   ;;  %s2690_s1 = inlined_call_operand.vmem [shape: f32[6,9], index: 1, kind: input, shape index: {}]   ;;  %s2691_s2 = inlined_call_operand.vmem [shape: f32[6,1], index: 2, kind: input, shape index: {}]   ;;  %s2692_s3 = inlined_call_operand.vmem [shape: f32[12,54], index: 3, kind: input, shape index: {}]   ;;  %s2693_s4 = inlined_call_operand.vmem [shape: f32[12,1], index: 4, kind: input, shape index: {}]   ;;  %s2694_s5 = inlined_call_operand.vmem [shape: f32[8,108], index: 5, kind: input, shape index: {}]   ;;  %s2695_s6 = inlined_call_operand.vmem [shape: f32[8,1], index: 6, kind: input, shape index: {}]   ;;  %s2696_s7 = inlined_call_operand.vmem [shape: f32[72,128], index: 7, kind: input, shape index: {}]   ;;  %s2697_s8 = inlined_call_operand.vmem [shape: f32[1,128], index: 8, kind: input, shape index: {}]   ;;  %s2698_s9 = inlined_call_operand.vmem [shape: f32[128,128], index: 9, kind: input, shape index: {}]   ;;  %s2699_s10 = inlined_call_operand.vmem [shape: f32[1,128], index: 10, kind: input, shape index: {}]   ;;  %s2700_s11 = inlined_call_operand.vmem [shape: f32[128,10], index: 11, kind: input, shape index: {}]   ;;  %s2701_s12 = inlined_call_operand.vmem [shape: f32[1,10], index: 12, kind: input, shape index: {}]   ;;  %s2702_s13 = inlined_call_operand.hbm [shape: f32[1,10], index: 13, kind: output, shape index: {}]  }
   0x1   :  { %v46_v0 = vld [vmem:[%s2690_s1] sm:$0x3f]  ;;  %1728 = vset.pattern.permute.xlu0 %v1765_v1  ;;  %1730 = vset.pattern.permute.xlu1 %v1766_v2 }
   0x2   :  { %72 = vperm.xlu0 %1728, %v46_v0   ;;  %164 = vperm.xlu1 %1730, %v46_v0  }
   0x3   :  { %18 = vsyncpa [#allocation7], 0  ;;  %v1767_v3 = vmov 5   ;;  %v1768_v4 = vmov 2   ;;  %v1769_v5 = vmov 4   ;;  %v1770_v6 = vmov 6  }
   0x4   :  { %1732 = vset.pattern.permute.xlu2 %v1767_v3  ;;  %v1771_v7 = vmov 7   ;;  %v1772_v8 = vmov 0   ;;  %v1773_v9 = vmov 8   ;;  %v1882_v10 = vld [vmem:[%s2689_s0] sm:$0x7f]  ;;  %s1774_s28 = smov 127  }
   0x5   :  { %256 = vperm.xlu2 %1732, %v46_v0   ;;  %v1885_v11 = vperm.slane %v1882_v10, 4  ;;  %v1888_v12 = vperm.slane %v1882_v10, 1  ;;  %v1891_v13 = vperm.slane %v1882_v10, 0  ;;  %v1900_v18 = vperm.slane %v1882_v10, 3  ;;  %s1775_s0 = smov 126   ;;  %s1776_s29 = smov 100  }
   0x6   :  { %v1903_v19 = vperm.slane %v1882_v10, 2  ;;  %s1777_s30 = smov 99   ;;  %v1930_v35 = vperm.slane %v1882_v10, 5  ;;  %s1778_s14 = smov 98   ;;  %vm99_vm0 = vcmask 1039360   ;;  %vm145_vm1 = vcmask 1031168  }
   0x7   :  { %s1779_s15 = smov 72   ;;  %s1780_s16 = smov 71   ;;  %vm191_vm2 = vcmask 818176   ;;  %vm237_vm3 = vcmask 809984   ;;  %vm283_vm4 = vcmask 801792   ;;  %vm335_vm5 = vcmask 588800  }
   0x8   :  { %s1781_s17 = smov 70   ;;  %vm386_vm6 = vcmask 580608   ;;  %vm437_vm7 = vcmask 572416   ;;  %vm558_vm14 = vcmask 87040   ;;  %s1783_s20 = smov 16   ;;  %vm858_vm15 = vcmask 1045504  }
   0x9   :  { %s1784_s21 = smov 14   ;;  %s1785_s22 = smov 68  }
   0xa   :  { %1729 = vset.pattern.permute.xlu0 %v1768_v4  ;;  %1731 = vset.pattern.permute.xlu1 %v1769_v5  ;;  %s1786_s23 = smov 124   ;;  %s1792_s19 = smov 19  }
   0xb   :  { %118 = vperm.xlu0 %1729, %v46_v0   ;;  %210 = vperm.xlu1 %1731, %v46_v0   ;;  %s1799_s24 = smov 18   ;;  %s1800_s25 = smov 9  }
   0xc   :  { %s1801_s26 = smov 54   ;;  %s1802_s1 = smov 45  }
   0xd   :  { %1733 = vset.pattern.permute.xlu2 %v1770_v6  ;;  %s1803_s27 = smov 36   ;;  %s1805_s18 = smov [#allocation6]  }
   0xe   :  { %302 = vperm.xlu2 %1733, %v46_v0  }
  0x13   :  { %1734 = vset.pattern.permute.xlu1 %v1771_v7  ;;  %1736 = vset.pattern.permute.xlu0 %v1772_v8 }
  0x14   :  { %355 = vperm.xlu1 %1734, %v46_v0   ;;  %49 = vperm.xlu0 %1736, %v46_v0  }
  0x16   :  { %1735 = vset.pattern.permute.xlu2 %v1773_v9 }
  0x17   :  { %406 = vperm.xlu2 %1735, %v46_v0  }
  0x1c   :  { %1737 = vset.pattern.permute.xlu1 %v1772_v8 }
  0x1f   :  { %1738 = vset.pattern.permute.xlu2 %v1772_v8  ;;  %v456_v8 = vld [vmem:[%s2691_s2] sm:$0x3f]  ;;  %s1782_s2 = smov 12  }
  0x5f   :  { %v257_v39 = vpop.permute.xlu2 %256 }
  0x60   :  { %v259_v40 = vmul.f32 %v257_v39, %v1891_v13  ;;  %v262_v43 = vmul.f32 %v257_v39, %v1900_v18  ;;  %v261_v48 = vmul.f32 %v257_v39, %v1903_v19  ;;  %v260_v49 = vmul.f32 %v257_v39, %v1888_v12 }
  0x61   :  { %v263_v52 = vmul.f32 %v257_v39, %v1885_v11  ;;  %v264_v3 = vmul.f32 %v257_v39, %v1930_v35 }
  0x68   :  { %v303_v46 = vpop.permute.xlu2 %302 }
  0x69   :  { %v307_v47 = vmul.f32 %v303_v46, %v1891_v13  ;;  %v310_v50 = vmul.f32 %v303_v46, %v1900_v18  ;;  %v309_v55 = vmul.f32 %v303_v46, %v1903_v19  ;;  %v308_v56 = vmul.f32 %v303_v46, %v1888_v12 }
  0x6a   :  { %v311_v60 = vmul.f32 %v303_v46, %v1885_v11 }
  0x71   :  { %v407_v57 = vpop.permute.xlu2 %406 }
  0x72   :  { %v409_v62 = vmul.f32 %v407_v57, %v1891_v13  ;;  %v412_v2 = vmul.f32 %v407_v57, %v1900_v18  ;;  %v411_v7 = vmul.f32 %v407_v57, %v1903_v19  ;;  %v410_v9 = vmul.f32 %v407_v57, %v1888_v12 }
  0x74   :  { %v73_v14 = vpop.permute.xlu0 %72  ;;  %v165_v24 = vpop.permute.xlu1 %164 }
  0x75   :  { %v79_v15 = vmul.f32 %v73_v14, %v1885_v11  ;;  %v76_v16 = vmul.f32 %v73_v14, %v1888_v12  ;;  %v75_v17 = vmul.f32 %v73_v14, %v1891_v13  ;;  %v78_v21 = vmul.f32 %v73_v14, %v1900_v18 }
  0x76   :  { %v77_v22 = vmul.f32 %v73_v14, %v1903_v19  ;;  %v167_v27 = vmul.f32 %v165_v24, %v1891_v13  ;;  %v170_v28 = vmul.f32 %v165_v24, %v1900_v18  ;;  %v169_v33 = vmul.f32 %v165_v24, %v1903_v19 }
  0x77   :  { %95 = vrot.lane.b32.xlu0 %v79_v15, %s1774_s28  ;;  %89 = vrot.lane.b32.xlu2 %v76_v16, %s1774_s28  ;;  %v168_v34 = vmul.f32 %v165_v24, %v1888_v12  ;;  %v80_v37 = vmul.f32 %v73_v14, %v1930_v35  ;;  %v171_v38 = vmul.f32 %v165_v24, %v1885_v11 }
  0x78   :  { %87 = vrot.lane.b32.xlu1 %v75_v17, %s1774_s28  ;;  %v172_v51 = vmul.f32 %v165_v24, %v1930_v35  ;;  %v305_v17 = vperm.slane %v1882_v10, 6 }
  0x7d   :  { %v119_v20 = vpop.permute.xlu0 %118  ;;  %v211_v31 = vpop.permute.xlu1 %210 }
  0x7e   :  { %v123_v23 = vmul.f32 %v119_v20, %v1903_v19  ;;  %v122_v25 = vmul.f32 %v119_v20, %v1888_v12  ;;  %v121_v26 = vmul.f32 %v119_v20, %v1891_v13  ;;  %v125_v29 = vmul.f32 %v119_v20, %v1885_v11 }
  0x7f   :  { %93 = vrot.lane.b32.xlu2 %v78_v21, %s1774_s28  ;;  %v124_v30 = vmul.f32 %v119_v20, %v1900_v18  ;;  %v213_v32 = vmul.f32 %v211_v31, %v1891_v13  ;;  %v216_v36 = vmul.f32 %v211_v31, %v1900_v18  ;;  %v215_v41 = vmul.f32 %v211_v31, %v1903_v19 }
  0x80   :  { %91 = vrot.lane.b32.xlu1 %v77_v22, %s1774_s28  ;;  %137 = vrot.lane.b32.xlu0 %v123_v23, %s1775_s0  ;;  %v214_v42 = vmul.f32 %v211_v31, %v1888_v12  ;;  %v126_v44 = vmul.f32 %v119_v20, %v1930_v35  ;;  %v217_v45 = vmul.f32 %v211_v31, %v1885_v11 }
  0x81   :  { %v218_v59 = vmul.f32 %v211_v31, %v1930_v35  ;;  %v312_v20 = vmul.f32 %v303_v46, %v1930_v35  ;;  %v413_v21 = vmul.f32 %v407_v57, %v1885_v11  ;;  %v313_v22 = vmul.f32 %v305_v17, %v303_v46 }
  0x86   :  { %v356_v53 = vpop.permute.xlu1 %355  ;;  %v1988_v5 = vpop.permute.xlu0 %49 }
  0x87   :  { %135 = vrot.lane.b32.xlu2 %v122_v25, %s1775_s0  ;;  %v358_v54 = vmul.f32 %v356_v53, %v1891_v13  ;;  %v361_v58 = vmul.f32 %v356_v53, %v1900_v18  ;;  %v360_v63 = vmul.f32 %v356_v53, %v1903_v19  ;;  %v359_v0 = vmul.f32 %v356_v53, %v1888_v12 }
  0x88   :  { %133 = vrot.lane.b32.xlu1 %v121_v26, %s1775_s0  ;;  %179 = vrot.lane.b32.xlu0 %v167_v27, %s1776_s29  ;;  %v362_v4 = vmul.f32 %v356_v53, %v1885_v11  ;;  %v414_v26 = vmul.f32 %v407_v57, %v1930_v35  ;;  %v363_v10 = vmul.f32 %v356_v53, %v1930_v35 }
  0x89   :  { %v364_v31 = vmul.f32 %v356_v53, %v305_v17 }
  0x8f   :  { %141 = vrot.lane.b32.xlu2 %v125_v29, %s1775_s0 }
  0x90   :  { %139 = vrot.lane.b32.xlu1 %v124_v30, %s1775_s0  ;;  %185 = vrot.lane.b32.xlu0 %v170_v28, %s1776_s29  ;;  %v415_v30 = vmul.f32 %v407_v57, %v305_v17 }
  0x97   :  { %183 = vrot.lane.b32.xlu2 %v169_v33, %s1776_s29 }
  0x98   :  { %181 = vrot.lane.b32.xlu1 %v168_v34, %s1776_s29  ;;  %225 = vrot.lane.b32.xlu0 %v213_v32, %s1777_s30 }
  0x9f   :  { %97 = vrot.lane.b32.xlu2 %v80_v37, %s1774_s28 }
  0xa0   :  { %187 = vrot.lane.b32.xlu1 %v171_v38, %s1776_s29  ;;  %231 = vrot.lane.b32.xlu0 %v216_v36, %s1777_s30 }
  0xa7   :  { %229 = vrot.lane.b32.xlu2 %v215_v41, %s1777_s30 }
  0xa8   :  { %227 = vrot.lane.b32.xlu1 %v214_v42, %s1777_s30  ;;  %271 = vrot.lane.b32.xlu0 %v259_v40, %s1778_s14 }
  0xaf   :  { %143 = vrot.lane.b32.xlu2 %v126_v44, %s1775_s0 }
  0xb0   :  { %233 = vrot.lane.b32.xlu1 %v217_v45, %s1777_s30  ;;  %277 = vrot.lane.b32.xlu0 %v262_v43, %s1778_s14 }
  0xb7   :  { %275 = vrot.lane.b32.xlu2 %v261_v48, %s1778_s14 }
  0xb8   :  { %273 = vrot.lane.b32.xlu1 %v260_v49, %s1778_s14  ;;  %321 = vrot.lane.b32.xlu0 %v307_v47, %s1779_s15 }
  0xbf   :  { %189 = vrot.lane.b32.xlu2 %v172_v51, %s1776_s29 }
  0xc0   :  { %279 = vrot.lane.b32.xlu1 %v263_v52, %s1778_s14  ;;  %327 = vrot.lane.b32.xlu0 %v310_v50, %s1779_s15 }
  0xc7   :  { %325 = vrot.lane.b32.xlu2 %v309_v55, %s1779_s15 }
  0xc8   :  { %323 = vrot.lane.b32.xlu1 %v308_v56, %s1779_s15  ;;  %372 = vrot.lane.b32.xlu0 %v358_v54, %s1780_s16 }
  0xcf   :  { %235 = vrot.lane.b32.xlu2 %v218_v59, %s1777_s30  ;;  %s1789_s30 = smov 32  }
  0xd0   :  { %329 = vrot.lane.b32.xlu1 %v311_v60, %s1779_s15  ;;  %378 = vrot.lane.b32.xlu0 %v361_v58, %s1780_s16  ;;  %v65_v60 = vmul.f32 %v1891_v13, %v1988_v5 }
  0xd1   :  { %v1974_v61 = vpop.permute.xlu2 %89 }
  0xd7   :  { %376 = vrot.lane.b32.xlu2 %v360_v63, %s1780_s16 }
  0xd8   :  { %374 = vrot.lane.b32.xlu1 %v359_v0, %s1780_s16  ;;  %423 = vrot.lane.b32.xlu0 %v409_v62, %s1781_s17  ;;  %v66_v62 = vmul.f32 %v1888_v12, %v1988_v5 }
  0xd9   :  { %v1982_v1 = vpop.permute.xlu2 %93 }
  0xdf   :  { %281 = vrot.lane.b32.xlu2 %v264_v3, %s1778_s14  ;;  %s1790_s14 = smov 8  }
  0xe0   :  { %380 = vrot.lane.b32.xlu1 %v362_v4, %s1780_s16  ;;  %429 = vrot.lane.b32.xlu0 %v412_v2, %s1781_s17 }
  0xe1   :  { %v1992_v6 = vpop.permute.xlu2 %135 }
  0xe7   :  { %427 = vrot.lane.b32.xlu2 %v411_v7, %s1781_s17 }
  0xe8   :  { %425 = vrot.lane.b32.xlu1 %v410_v9, %s1781_s17  ;;  %459 = vperm.xlu0 %1736, %v456_v8  }
  0xe9   :  { %v2001_v14 = vpop.permute.xlu0 %95  ;;  %v2003_v15 = vpop.permute.xlu2 %141 }
  0xea   :  { %v88_v16 = vpop.permute.xlu1 %87 }
  0xeb   :  { %v100_v2 = vsel %vm99_vm0, %v88_v16, %v1974_v61 }
  0xec   :  { %v111_v8 = vadd.f32 %v100_v2, %v65_v60 }
  0xef   :  { %331 = vrot.lane.b32.xlu2 %v312_v20, %s1779_s15 }
  0xf0   :  { %431 = vrot.lane.b32.xlu1 %v413_v21, %s1781_s17  ;;  %333 = vrot.lane.b32.xlu0 %v313_v22, %s1779_s15 }
  0xf1   :  { %v2011_v23 = vpop.permute.xlu2 %183 }
  0xf2   :  { %v2013_v24 = vpop.permute.xlu1 %91  ;;  %v2015_v25 = vpop.permute.xlu0 %137 }
  0xf3   :  { %v101_v58 = vsel %vm99_vm0, %v1974_v61, %v2013_v24  ;;  %v147_v4 = vsel %vm145_vm1, %v1992_v6, %v2015_v25  ;;  %v68_v61 = vmul.f32 %v1900_v18, %v1988_v5 }
  0xf4   :  { %v112_v3 = vadd.f32 %v101_v58, %v66_v62 }
  0xf6   :  { %v158_v9 = vadd.f32 %v147_v4, %v112_v3 }
  0xf7   :  { %433 = vrot.lane.b32.xlu2 %v414_v26, %s1781_s17 }
  0xf8   :  { %382 = vrot.lane.b32.xlu1 %v363_v10, %s1780_s16 }
  0xf9   :  { %v2021_v27 = vpop.permute.xlu2 %97 }
  0xfa   :  { %v134_v28 = vpop.permute.xlu1 %133  ;;  %v180_v29 = vpop.permute.xlu0 %179 }
  0xfb   :  { %v146_v7 = vsel %vm145_vm1, %v134_v28, %v1992_v6  ;;  %v103_v6 = vsel %vm99_vm0, %v1982_v1, %v2001_v14 }
  0xfc   :  { %v157_v17 = vadd.f32 %v146_v7, %v111_v8 }
  0xff   :  { %435 = vrot.lane.b32.xlu2 %v415_v30, %s1781_s17 }
 0x100   :  { %384 = vrot.lane.b32.xlu1 %v364_v31, %s1780_s16 }
 0x101   :  { %v2029_v34 = vpop.permute.xlu2 %229 }
 0x102   :  { %v2025_v32 = vpop.permute.xlu1 %139  ;;  %v2027_v33 = vpop.permute.xlu0 %185 }
 0x109   :  { %v2031_v38 = vpop.permute.xlu2 %143 }
 0x10a   :  { %v182_v36 = vpop.permute.xlu1 %181  ;;  %v226_v37 = vpop.permute.xlu0 %225 }
 0x10b   :  { %v192_v13 = vsel %vm191_vm2, %v180_v29, %v182_v36  ;;  %v193_v12 = vsel %vm191_vm2, %v182_v36, %v2011_v23  ;;  %v149_v29 = vsel %vm145_vm1, %v2025_v32, %v2003_v15 }
 0x10c   :  { %v203_v21 = vadd.f32 %v192_v13, %v157_v17  ;;  %v204_v22 = vadd.f32 %v193_v12, %v158_v9 }
 0x111   :  { %v2037_v41 = vpop.permute.xlu2 %275 }
 0x112   :  { %v2033_v39 = vpop.permute.xlu1 %187  ;;  %v2035_v40 = vpop.permute.xlu0 %231 }
 0x119   :  { %v2039_v44 = vpop.permute.xlu2 %189 }
 0x11a   :  { %v228_v42 = vpop.permute.xlu1 %227  ;;  %v272_v43 = vpop.permute.xlu0 %271 }
 0x11b   :  { %v238_v16 = vsel %vm237_vm3, %v226_v37, %v228_v42  ;;  %v239_v20 = vsel %vm237_vm3, %v228_v42, %v2029_v34  ;;  %v114_v37 = vadd.f32 %v103_v6, %v68_v61  ;;  %v104_v61 = vsel %vm99_vm0, %v2001_v14, %v2021_v27 }
 0x11c   :  { %v249_v30 = vadd.f32 %v238_v16, %v203_v21  ;;  %v250_v31 = vadd.f32 %v239_v20, %v204_v22  ;;  %v69_v21 = vmul.f32 %v1885_v11, %v1988_v5  ;;  %v150_v14 = vsel %vm145_vm1, %v2003_v15, %v2031_v38 }
 0x11d   :  { %v160_v62 = vadd.f32 %v149_v29, %v114_v37 }
 0x121   :  { %v2045_v49 = vpop.permute.xlu2 %325 }
 0x122   :  { %v2041_v45 = vpop.permute.xlu1 %233  ;;  %v2043_v46 = vpop.permute.xlu0 %277 }
 0x129   :  { %v2051_v52 = vpop.permute.xlu2 %235 }
 0x12a   :  { %v274_v47 = vpop.permute.xlu1 %273  ;;  %v322_v48 = vpop.permute.xlu0 %321  ;;  %v242_v15 = vsel %vm237_vm3, %v2041_v45, %v2051_v52 }
 0x12b   :  { %v284_v10 = vsel %vm283_vm4, %v272_v43, %v274_v47  ;;  %v285_v28 = vsel %vm283_vm4, %v274_v47, %v2037_v41  ;;  %v195_v47 = vsel %vm191_vm2, %v2027_v33, %v2033_v39 }
 0x12c   :  { %v295_v58 = vadd.f32 %v284_v10, %v249_v30  ;;  %v296_v60 = vadd.f32 %v285_v28, %v250_v31  ;;  %v115_v30 = vadd.f32 %v104_v61, %v69_v21 }
 0x131   :  { %v2053_v55 = vpop.permute.xlu2 %376 }
 0x132   :  { %v2047_v50 = vpop.permute.xlu1 %279  ;;  %v2049_v51 = vpop.permute.xlu0 %327 }
 0x133   :  { %v287_v8 = vsel %vm283_vm4, %v2043_v46, %v2047_v50 }
 0x139   :  { %v2062_v59 = vpop.permute.xlu2 %281 }
 0x13a   :  { %v324_v53 = vpop.permute.xlu1 %323  ;;  %v373_v54 = vpop.permute.xlu0 %372 }
 0x13b   :  { %v336_v42 = vsel %vm335_vm5, %v322_v48, %v324_v53  ;;  %v337_v43 = vsel %vm335_vm5, %v324_v53, %v2045_v49  ;;  %v241_v48 = vsel %vm237_vm3, %v2035_v40, %v2041_v45  ;;  %v206_v53 = vadd.f32 %v195_v47, %v160_v62 }
 0x13c   :  { %v348_v4 = vadd.f32 %v336_v42, %v295_v58  ;;  %v349_v7 = vadd.f32 %v337_v43, %v296_v60  ;;  %v196_v43 = vsel %vm191_vm2, %v2033_v39, %v2039_v44  ;;  %v161_v47 = vadd.f32 %v150_v14, %v115_v30 }
 0x13d   :  { %v252_v17 = vadd.f32 %v241_v48, %v206_v53 }
 0x13e   :  { %v207_v39 = vadd.f32 %v196_v43, %v161_v47 }
 0x13f   :  { %v298_v22 = vadd.f32 %v287_v8, %v252_v17  ;;  %v67_v8 = vmul.f32 %v1903_v19, %v1988_v5 }
 0x140   :  { %v253_v53 = vadd.f32 %v242_v15, %v207_v39 }
 0x141   :  { %v2096_v36 = vpop.permute.xlu2 %427 }
 0x142   :  { %v2055_v56 = vpop.permute.xlu1 %329  ;;  %v2057_v57 = vpop.permute.xlu0 %378 }
 0x143   :  { %v339_v16 = vsel %vm335_vm5, %v2049_v51, %v2055_v56 }
 0x144   :  { %v351_v31 = vadd.f32 %v339_v16, %v298_v22 }
 0x14a   :  { %v375_v63 = vpop.permute.xlu1 %374  ;;  %v424_v0 = vpop.permute.xlu0 %423 }
 0x14b   :  { %v387_v2 = vsel %vm386_vm6, %v373_v54, %v375_v63  ;;  %v388_v3 = vsel %vm386_vm6, %v375_v63, %v2053_v55 }
 0x14c   :  { %v399_v13 = vadd.f32 %v387_v2, %v348_v4  ;;  %v400_v12 = vadd.f32 %v388_v3, %v349_v7  ;;  %v288_v4 = vsel %vm283_vm4, %v2047_v50, %v2062_v59  ;;  %v70_v7 = vmul.f32 %v1930_v35, %v1988_v5 }
 0x14d   :  { %v299_v17 = vadd.f32 %v288_v4, %v253_v53  ;;  %v148_v35 = vsel %vm145_vm1, %v2015_v25, %v2025_v32  ;;  %v194_v25 = vsel %vm191_vm2, %v2011_v23, %v2027_v33  ;;  %v286_v23 = vsel %vm283_vm4, %v2037_v41, %v2043_v46 }
 0x14e   :  { %vm702_vm4 = vcmask 556032  }
 0x152   :  { %v2086_v26 = vpop.permute.xlu1 %380  ;;  %v2091_v18 = vpop.permute.xlu0 %429 }
 0x153   :  { %v390_v37 = vsel %vm386_vm6, %v2057_v57, %v2086_v26 }
 0x154   :  { %v402_v58 = vadd.f32 %v390_v37, %v351_v31  ;;  %v389_v37 = vsel %vm386_vm6, %v2053_v55, %v2057_v57 }
 0x15a   :  { %v426_v9 = vpop.permute.xlu1 %425  ;;  %v2124_v10 = vpop.permute.xlu0 %459 }
 0x15b   :  { %v438_v54 = vsel %vm437_vm7, %v424_v0, %v426_v9  ;;  %v439_v63 = vsel %vm437_vm7, %v426_v9, %v2096_v36  ;;  %v332_v0 = vpop.permute.xlu2 %331  ;;  %v116_v9 = vadd.f32 %v2021_v27, %v70_v7 }
 0x15c   :  { %v450_v20 = vadd.f32 %v438_v54, %v399_v13  ;;  %v451_v6 = vadd.f32 %v439_v63, %v400_v12  ;;  %v102_v13 = vsel %vm99_vm0, %v2013_v24, %v1982_v1  ;;  %v340_v12 = vsel %vm335_vm5, %v2055_v56, %v332_v0 }
 0x15d   :  { %v113_v63 = vadd.f32 %v102_v13, %v67_v8  ;;  %v162_v19 = vadd.f32 %v2031_v38, %v116_v9  ;;  %v352_v5 = vadd.f32 %v340_v12, %v299_v17 }
 0x15e   :  { %v463_v28 = vadd.f32 %v2124_v10, %v451_v6  ;;  %v462_v29 = vadd.f32 %v2124_v10, %v450_v20 }
 0x15f   :  { %v159_v24 = vadd.f32 %v148_v35, %v113_v63  ;;  %v208_v27 = vadd.f32 %v2039_v44, %v162_v19 }
 0x160   :  { %vm469_vm8 = vcmp.ge.f32.partialorder %v463_v28, 0.0  ;;  %v475_v11 = vmul.f32 0.01, %v463_v28  ;;  %vm468_vm9 = vcmp.ge.f32.partialorder %v462_v29, 0.0  ;;  %v474_v42 = vmul.f32 0.01, %v462_v29 }
 0x161   :  { %v254_v38 = vadd.f32 %v2051_v52, %v208_v27  ;;  %v205_v22 = vadd.f32 %v194_v25, %v159_v24 }
 0x162   :  { %v432_v60 = vpop.permute.xlu1 %431  ;;  %v2137_v62 = vsel %vm469_vm8, %v463_v28, %v475_v11  ;;  %v2139_v2 = vsel %vm468_vm9, %v462_v29, %v474_v42  ;;  %v334_v56 = vpop.permute.xlu0 %333  ;;  %v440_v42 = vsel %vm437_vm7, %v2096_v36, %v2091_v18  ;;  %vm636_vm8 = vcmask 82944  }
 0x163   :  { %v441_v3 = vsel %vm437_vm7, %v2091_v18, %v432_v60  ;;  %494 = vrot.lane.b32.xlu1 %v2137_v62, %s1774_s28  ;;  %492 = vrot.lane.b32.xlu0 %v2139_v2, %s1774_s28  ;;  %v434_v50 = vpop.permute.xlu2 %433  ;;  %v341_v21 = vsel %vm335_vm5, %v332_v0, %v334_v56  ;;  %v300_v44 = vadd.f32 %v2062_v59, %v254_v38  ;;  %vm593_vm9 = vcmask 89094  }
 0x164   :  { %v453_v48 = vadd.f32 %v441_v3, %v402_v58  ;;  %v442_v32 = vsel %vm437_vm7, %v432_v60, %v434_v50 }
 0x165   :  { %v353_v30 = vadd.f32 %v341_v21, %v300_v44 }
 0x166   :  { %v465_v45 = vadd.f32 %v2124_v10, %v453_v48 }
 0x168   :  { %vm471_vm10 = vcmp.ge.f32.partialorder %v465_v45, 0.0  ;;  %v477_v54 = vmul.f32 0.01, %v465_v45 }
 0x16a   :  { %v383_v61 = vpop.permute.xlu1 %382  ;;  %v2168_v16 = vsel %vm471_vm10, %v465_v45, %v477_v54  ;;  %vm599_vm10 = vcmask 84992  }
 0x16b   :  { %v391_v1 = vsel %vm386_vm6, %v2086_v26, %v383_v61  ;;  %498 = vrot.lane.b32.xlu0 %v2168_v16, %s1774_s28  ;;  %v240_v26 = vsel %vm237_vm3, %v2029_v34, %v2035_v40  ;;  %v436_v29 = vpop.permute.xlu2 %435  ;;  %v338_v34 = vsel %vm335_vm5, %v2045_v49, %v2049_v51  ;;  %vm732_vm3 = vcmask 130048  }
 0x16c   :  { %v403_v20 = vadd.f32 %v391_v1, %v352_v5  ;;  %v251_v33 = vadd.f32 %v240_v26, %v205_v22  ;;  %v443_v41 = vsel %vm437_vm7, %v434_v50, %v436_v29 }
 0x16e   :  { %v454_v6 = vadd.f32 %v442_v32, %v403_v20  ;;  %v297_v0 = vadd.f32 %v286_v23, %v251_v33 }
 0x170   :  { %v466_v28 = vadd.f32 %v2124_v10, %v454_v6  ;;  %v350_v46 = vadd.f32 %v338_v34, %v297_v0 }
 0x172   :  { %v385_v52 = vpop.permute.xlu1 %384  ;;  %vm472_vm11 = vcmp.ge.f32.partialorder %v466_v28, 0.0  ;;  %v478_v14 = vmul.f32 0.01, %v466_v28  ;;  %v401_v49 = vadd.f32 %v389_v37, %v350_v46 }
 0x173   :  { %v392_v40 = vsel %vm386_vm6, %v383_v61, %v385_v52  ;;  %vm616_vm6 = vcmask 1014784  }
 0x174   :  { %v404_v59 = vadd.f32 %v392_v40, %v353_v30  ;;  %v484_v31 = vsel %vm472_vm11, %v466_v28, %v478_v14  ;;  %v452_v43 = vadd.f32 %v440_v42, %v401_v49  ;;  %vm666_vm11 = vcmask 89090  }
 0x175   :  { %500 = vrot.lane.b32.xlu1 %v484_v31, %s1774_s28 }
 0x176   :  { %v455_v11 = vadd.f32 %v443_v41, %v404_v59  ;;  %v464_v60 = vadd.f32 %v2124_v10, %v452_v43 }
 0x178   :  { %v467_v51 = vadd.f32 %v2124_v10, %v455_v11  ;;  %v476_v55 = vmul.f32 0.01, %v464_v60  ;;  %vm470_vm13 = vcmp.ge.f32.partialorder %v464_v60, 0.0 }
 0x17a   :  { %vm473_vm12 = vcmp.ge.f32.partialorder %v467_v51, 0.0  ;;  %v479_v47 = vmul.f32 0.01, %v467_v51  ;;  %v482_v57 = vsel %vm470_vm13, %v464_v60, %v476_v55 }
 0x17c   :  { %v485_v58 = vsel %vm473_vm12, %v467_v51, %v479_v47  ;;  %vm851_vm12 = vcmask 441344  }
 0x17d   :  { %502 = vrot.lane.b32.xlu2 %v485_v58, %s1774_s28 }
 0x185   :  { %496 = vrot.lane.b32.xlu2 %v482_v57, %s1774_s28  ;;  %s1804_s28 = smov 63  }
 0x1d5   :  { %v495_v15 = vpop.permute.xlu1 %494  ;;  %v493_v3 = vpop.permute.xlu0 %492 }
 0x1d6   :  { %v504_v18 = vsel %vm99_vm0, %v493_v3, %v495_v15 }
 0x1d7   :  { %v514_v36 = vmax.f32 %v2139_v2, %v504_v18  ;;  %v503_v39 = vpop.permute.xlu2 %502 }
 0x1d8   :  { %v520_v48 = vmax.f32 %v485_v58, %v503_v39 }
 0x1d9   :  { %527 = vrot.lane.b32.xlu0 %v514_v36, %s1776_s29 }
 0x1da   :  { %537 = vrot.lane.b32.xlu2 %v520_v48, %s1776_s29 }
 0x1dd   :  { %v499_v10 = vpop.permute.xlu0 %498 }
 0x1df   :  { %v497_v4 = vpop.permute.xlu2 %496 }
 0x1e0   :  { %v505_v7 = vsel %vm99_vm0, %v495_v15, %v497_v4  ;;  %v506_v53 = vsel %vm99_vm0, %v497_v4, %v499_v10 }
 0x1e1   :  { %v515_v45 = vmax.f32 %v2137_v62, %v505_v7  ;;  %v516_v8 = vmax.f32 %v482_v57, %v506_v53 }
 0x1e3   :  { %529 = vrot.lane.b32.xlu1 %v515_v45, %s1776_s29  ;;  %531 = vrot.lane.b32.xlu2 %v516_v8, %s1776_s29 }
 0x1e7   :  { %v501_v2 = vpop.permute.xlu1 %500 }
 0x1e8   :  { %v507_v13 = vsel %vm99_vm0, %v499_v10, %v501_v2  ;;  %v508_v12 = vsel %vm99_vm0, %v501_v2, %v503_v39  ;;  %vm787_vm0 = vcmask 97280  }
 0x1e9   :  { %v517_v9 = vmax.f32 %v2168_v16, %v507_v13  ;;  %v518_v17 = vmax.f32 %v484_v31, %v508_v12 }
 0x1eb   :  { %535 = vrot.lane.b32.xlu1 %v518_v17, %s1776_s29  ;;  %533 = vrot.lane.b32.xlu0 %v517_v9, %s1776_s29 }
 0x234   :  { %v538_v50 = vpop.permute.xlu2 %537 }
 0x23d   :  { %v532_v54 = vpop.permute.xlu2 %531 }
 0x24b   :  { %v528_v62 = vpop.permute.xlu0 %527 }
 0x255   :  { %v530_v35 = vpop.permute.xlu1 %529 }
 0x256   :  { %v539_v63 = vsel %vm191_vm2, %v528_v62, %v530_v35  ;;  %v540_v19 = vsel %vm191_vm2, %v530_v35, %v532_v54 }
 0x257   :  { %v549_v5 = vmax.f32 %v514_v36, %v539_v63  ;;  %v550_v61 = vmax.f32 %v515_v45, %v540_v19 }
 0x259   :  { %554 = vst [vmem:[#allocation2] sm:$0x3f] %v549_v5  ;;  %779 = vrot.lane.b32.xlu1 %v550_v61, %s1782_s2  ;;  %668 = vrot.lane.b32.xlu2 %v549_v5, %s1781_s17  ;;  %v601_v38 = vrot.slane %v549_v5, 4  ;;  %v638_v6 = vrot.slane %v549_v5, 6  ;;  %v639_v26 = vrot.slane %v550_v61, 6  ;;  %v566_v21 = vrot.slane %v550_v61, 2 }
 0x25a   :  { %555 = vst [vmem:[#allocation2 + $0x8] sm:$0x3f] %v550_v61  ;;  %777 = vrot.lane.b32.xlu0 %v549_v5, %s1782_s2  ;;  %v602_v22 = vrot.slane %v550_v61, 4  ;;  %v565_v44 = vrot.slane %v549_v5, 2 }
 0x25d   :  { %v536_v16 = vpop.permute.xlu1 %535  ;;  %v534_v1 = vpop.permute.xlu0 %533 }
 0x25e   :  { %v543_v24 = vsel %vm191_vm2, %v536_v16, %v538_v50  ;;  %v541_v27 = vsel %vm191_vm2, %v532_v54, %v534_v1  ;;  %v542_v56 = vsel %vm191_vm2, %v534_v1, %v536_v16  ;;  %vm762_vm2 = vcmask 113664  }
 0x25f   :  { %v2227_v20 = vmax.f32 %v518_v17, %v543_v24  ;;  %v551_v25 = vmax.f32 %v516_v8, %v541_v27  ;;  %v552_v32 = vmax.f32 %v517_v9, %v542_v56 }
 0x261   :  { %556 = vst [vmem:[#allocation2 + $0x10] sm:$0x3f] %v551_v25  ;;  %672 = vrot.lane.b32.xlu2 %v551_v25, %s1781_s17  ;;  %781 = vrot.lane.b32.xlu1 %v551_v25, %s1782_s2  ;;  %v640_v28 = vrot.slane %v551_v25, 6  ;;  %v567_v23 = vrot.slane %v551_v25, 2  ;;  %v603_v33 = vrot.slane %v551_v25, 4  ;;  %v641_v29 = vrot.slane %v552_v32, 6 }
 0x262   :  { %557 = vst [vmem:[#allocation2 + $0x18] sm:$0x3f] %v552_v32  ;;  %670 = vrot.lane.b32.xlu0 %v550_v61, %s1781_s17  ;;  %v604_v30 = vrot.slane %v552_v32, 4  ;;  %v605_v52 = vrot.slane %v2227_v20, 4  ;;  %v568_v14 = vrot.slane %v552_v32, 2  ;;  %v569_v34 = vrot.slane %v2227_v20, 2 }
 0x263   :  { %559 = vst.msk [vmem:[#allocation2 + $0x20] sm:$0x3f] %vm558_vm14, %v2227_v20  ;;  %v642_v0 = vrot.slane %v2227_v20, 6 }
 0x269   :  { %785 = vrot.lane.b32.xlu2 %v2227_v20, %s1782_s2  ;;  %674 = vrot.lane.b32.xlu1 %v552_v32, %s1781_s17 }
 0x26a   :  { %783 = vrot.lane.b32.xlu0 %v552_v32, %s1782_s2 }
 0x271   :  { %722 = vrot.lane.b32.xlu2 %v601_v38, %s1783_s20  ;;  %752 = vrot.lane.b32.xlu1 %v638_v6, %s1784_s21 }
 0x272   :  { %676 = vrot.lane.b32.xlu0 %v2227_v20, %s1781_s17 }
 0x279   :  { %754 = vrot.lane.b32.xlu2 %v639_v26, %s1784_s21  ;;  %694 = vrot.lane.b32.xlu1 %v566_v21, %s1785_s22 }
 0x27a   :  { %724 = vrot.lane.b32.xlu0 %v602_v22, %s1783_s20 }
 0x281   :  { %606 = vrot.lane.b32.xlu2 %v601_v38, %s1786_s23  ;;  %643 = vrot.lane.b32.xlu1 %v638_v6, %s1779_s15 }
 0x282   :  { %692 = vrot.lane.b32.xlu0 %v565_v44, %s1785_s22 }
 0x289   :  { %645 = vrot.lane.b32.xlu2 %v639_v26, %s1779_s15  ;;  %756 = vrot.lane.b32.xlu1 %v640_v28, %s1784_s21 }
 0x28a   :  { %608 = vrot.lane.b32.xlu0 %v602_v22, %s1786_s23 }
 0x291   :  { %570 = vrot.lane.b32.xlu2 %v565_v44, %s1775_s0  ;;  %696 = vrot.lane.b32.xlu1 %v567_v23, %s1785_s22 }
 0x292   :  { %726 = vrot.lane.b32.xlu0 %v603_v33, %s1783_s20 }
 0x299   :  { %574 = vrot.lane.b32.xlu2 %v567_v23, %s1775_s0  ;;  %647 = vrot.lane.b32.xlu1 %v640_v28, %s1779_s15 }
 0x29a   :  { %572 = vrot.lane.b32.xlu0 %v566_v21, %s1775_s0 }
 0x2a1   :  { %758 = vrot.lane.b32.xlu2 %v641_v29, %s1784_s21  ;;  %728 = vrot.lane.b32.xlu1 %v604_v30, %s1783_s20 }
 0x2a2   :  { %610 = vrot.lane.b32.xlu0 %v603_v33, %s1786_s23 }
 0x2a9   :  { %730 = vrot.lane.b32.xlu2 %v605_v52, %s1783_s20  ;;  %649 = vrot.lane.b32.xlu1 %v641_v29, %s1779_s15 }
 0x2aa   :  { %698 = vrot.lane.b32.xlu0 %v568_v14, %s1785_s22 }
 0x2b1   :  { %700 = vrot.lane.b32.xlu2 %v569_v34, %s1785_s22  ;;  %576 = vrot.lane.b32.xlu1 %v568_v14, %s1775_s0  ;;  %s1796_s22 = smov 38  }
 0x2b2   :  { %612 = vrot.lane.b32.xlu0 %v604_v30, %s1786_s23 }
 0x2b3   :  { %v669_v40 = vpop.permute.xlu2 %668 }
 0x2b9   :  { %651 = vrot.lane.b32.xlu2 %v642_v0, %s1779_s15  ;;  %614 = vrot.lane.b32.xlu1 %v605_v52, %s1786_s23 }
 0x2ba   :  { %760 = vrot.lane.b32.xlu0 %v642_v0, %s1784_s21  ;;  %s1795_s21 = smov 13  }
 0x2bb   :  { %v673_v59 = vpop.permute.xlu2 %672 }
 0x2c2   :  { %578 = vrot.lane.b32.xlu0 %v569_v34, %s1775_s0 }
 0x2c3   :  { %v786_v31 = vpop.permute.xlu2 %785 }
 0x2c4   :  { %801 = vst.msk [vmem:[#allocation2 + $0x110] sm:$0x3f] %vm558_vm14, %v786_v31 }
 0x2cb   :  { %v780_v37 = vpop.permute.xlu1 %779  ;;  %v723_v41 = vpop.permute.xlu2 %722  ;;  %v838_v46 = vld [vmem:[#allocation2 + $0x110] sm:$0x3f] }
 0x2cc   :  { %v778_v11 = vpop.permute.xlu0 %777  ;;  %1679 = vmatpush.msk.msra.mxu0 %vm858_vm15, %v838_v46 }
 0x2cd   :  { %v788_v42 = vsel %vm787_vm0, %v778_v11, %v780_v37 }
 0x2ce   :  { %797 = vst [vmem:[#allocation2 + $0xf0] sm:$0x3f] %v788_v42 }
 0x2d3   :  { %v755_v49 = vpop.permute.xlu2 %754  ;;  %v782_v51 = vpop.permute.xlu1 %781 }
 0x2d4   :  { %v789_v43 = vsel %vm787_vm0, %v780_v37, %v782_v51  ;;  %v671_v47 = vpop.permute.xlu0 %670 }
 0x2d5   :  { %798 = vst [vmem:[#allocation2 + $0xf8] sm:$0x3f] %v789_v43  ;;  %v678_v58 = vsel %vm437_vm7, %v669_v40, %v671_v47  ;;  %v679_v60 = vsel %vm437_vm7, %v671_v47, %v673_v59  ;;  %v834_v55 = vld [vmem:[#allocation2 + $0xf0] sm:$0x3f] }
 0x2d6   :  { %687 = vst [vmem:[#allocation2 + $0x78] sm:$0x3f] %v678_v58  ;;  %1667 = vmatpush.msk.msra.mxu2 %vm858_vm15, %v834_v55  ;;  %v2327_v55 = vld [vmem:[%s2692_s3 + $0x8] sm:$0xf] }
 0x2d7   :  { %688 = vst [vmem:[#allocation2 + $0x80] sm:$0x3f] %v679_v60 }
 0x2db   :  { %v607_v57 = vpop.permute.xlu2 %606  ;;  %v675_v15 = vpop.permute.xlu1 %674 }
 0x2dc   :  { %v680_v3 = vsel %vm437_vm7, %v673_v59, %v675_v15  ;;  %v784_v18 = vpop.permute.xlu0 %783  ;;  %v835_v36 = vld [vmem:[#allocation2 + $0xf8] sm:$0x3f] }
 0x2dd   :  { %689 = vst [vmem:[#allocation2 + $0x88] sm:$0x3f] %v680_v3  ;;  %v790_v39 = vsel %vm787_vm0, %v782_v51, %v784_v18  ;;  %v791_v48 = vsel %vm787_vm0, %v784_v18, %v786_v31  ;;  %1670 = vmatpush.msk.msra.mxu1 %vm858_vm15, %v835_v36  ;;  %v2318_v51 = vld [vmem:[%s2692_s3] sm:$0xff] }
 0x2de   :  { %799 = vst [vmem:[#allocation2 + $0x100] sm:$0x3f] %v790_v39  ;;  %v839_v36 = vld [vmem:[%s2693_s4] sm:$0xff] }
 0x2df   :  { %800 = vst [vmem:[#allocation2 + $0x108] sm:$0x3f] %v791_v48  ;;  %843 = vperm.xlu2 %1738, %v839_v36  }
 0x2e3   :  { %v646_v10 = vpop.permute.xlu2 %645  ;;  %v753_v4 = vpop.permute.xlu1 %752 }
 0x2e4   :  { %v763_v7 = vsel %vm762_vm2, %v753_v4, %v755_v49  ;;  %v677_v53 = vpop.permute.xlu0 %676 }
 0x2e5   :  { %772 = vst [vmem:[#allocation2 + $0xc8] sm:$0xfc] %v763_v7  ;;  %v681_v45 = vsel %vm437_vm7, %v675_v15, %v677_v53  ;;  %vm630_vm7 = vcmask 89092  }
 0x2e6   :  { %690 = vst [vmem:[#allocation2 + $0x90] sm:$0x3f] %v681_v45 }
 0x2e7   :  { %691 = vst.msk [vmem:[#allocation2 + $0x98] sm:$0x3f] %vm558_vm14, %v677_v53 }
 0x2eb   :  { %v571_v8 = vpop.permute.xlu2 %570  ;;  %v695_v2 = vpop.permute.xlu1 %694 }
 0x2ec   :  { %v725_v13 = vpop.permute.xlu0 %724 }
 0x2ed   :  { %v733_v12 = vsel %vm732_vm3, %v723_v41, %v725_v13  ;;  %v836_v41 = vld [vmem:[#allocation2 + $0x100] sm:$0x3f] }
 0x2ee   :  { %742 = vst [vmem:[#allocation2 + $0xa0] sm:$0xf0] %v733_v12 }
 0x2ef   :  { %747 = vst [vmem:[#allocation2 + $0xc8] sm:$0x3] %v733_v12 }
 0x2f3   :  { %v644_v9 = vpop.permute.xlu1 %643  ;;  %v2288_v17 = vpop.permute.xlu2 %574 }
 0x2f4   :  { %v653_v50 = vsel %vm335_vm5, %v644_v9, %v646_v10  ;;  %v693_v54 = vpop.permute.xlu0 %692 }
 0x2f5   :  { %662 = vst [vmem:[#allocation2 + $0x50] sm:$0xfc] %v653_v50  ;;  %v703_v62 = vsel %vm702_vm4, %v693_v54, %v695_v2 }
 0x2f6   :  { %712 = vst [vmem:[#allocation2 + $0x78] sm:$0xc0] %v703_v62  ;;  %v829_v35 = vld [vmem:[#allocation2 + $0xc8] sm:$0xff] }
 0x2f7   :  { %717 = vst [vmem:[#allocation2 + $0xa0] sm:$0xf] %v703_v62  ;;  %884 = vmatpush.msra.mxu2 %v829_v35 }
 0x2fb   :  { %v757_v63 = vpop.permute.xlu1 %756  ;;  %v2292_v19 = vpop.permute.xlu2 %758 }
 0x2fc   :  { %v764_v5 = vsel %vm762_vm2, %v755_v49, %v757_v63  ;;  %v765_v61 = vsel %vm762_vm2, %v757_v63, %v2292_v19  ;;  %v609_v16 = vpop.permute.xlu0 %608 }
 0x2fd   :  { %773 = vst [vmem:[#allocation2 + $0xd0] sm:$0xfc] %v764_v5  ;;  %v617_v1 = vsel %vm616_vm6, %v607_v57, %v609_v16  ;;  %v819_v27 = vld [vmem:[#allocation2 + $0x78] sm:$0xff] }
 0x2fe   :  { %774 = vst [vmem:[#allocation2 + $0xd8] sm:$0xfc] %v765_v61  ;;  %v824_v24 = vld [vmem:[#allocation2 + $0xa0] sm:$0xff] }
 0x2ff   :  { %626 = vst [vmem:[#allocation2 + $0x28] sm:$0xf0] %v617_v1  ;;  %885 = vmatpush.msra.mxu2 %v824_v24 }
 0x300   :  { %632 = vst [vmem:[#allocation2 + $0x50] sm:$0x3] %v617_v1 }
 0x301   :  { %886 = vmatpush.msra.mxu2 %v819_v27 }
 0x303   :  { %v731_v56 = vpop.permute.xlu2 %730  ;;  %v697_v20 = vpop.permute.xlu1 %696 }
 0x304   :  { %746 = vst.msk [vmem:[#allocation2 + $0xc0] sm:$0xf0] %vm630_vm7, %v731_v56  ;;  %v704_v25 = vsel %vm702_vm4, %v695_v2, %v697_v20  ;;  %v727_v32 = vpop.permute.xlu0 %726  ;;  %v840_v2 = vld [vmem:[%s2693_s4 + $0x8] sm:$0xf]  ;;  %s1787_s4 = smov 24  }
 0x305   :  { %751 = vst.msk [vmem:[#allocation2 + $0xe8] sm:$0x3] %vm636_vm8, %v731_v56  ;;  %v734_v38 = vsel %vm732_vm3, %v725_v13, %v727_v32  ;;  %848 = vperm.xlu1 %1737, %v840_v2  }
 0x306   :  { %713 = vst [vmem:[#allocation2 + $0x80] sm:$0xc0] %v704_v25 }
 0x307   :  { %718 = vst [vmem:[#allocation2 + $0xa8] sm:$0xf] %v704_v25  ;;  %v814_v6 = vld [vmem:[#allocation2 + $0x50] sm:$0xff] }
 0x308   :  { %743 = vst [vmem:[#allocation2 + $0xa8] sm:$0xf0] %v734_v38  ;;  %887 = vmatpush.msra.mxu2 %v814_v6 }
 0x309   :  { %748 = vst [vmem:[#allocation2 + $0xd0] sm:$0x3] %v734_v38 }
 0x30b   :  { %v701_v26 = vpop.permute.xlu2 %700  ;;  %v648_v21 = vpop.permute.xlu1 %647 }
 0x30c   :  { %716 = vst.msk [vmem:[#allocation2 + $0x98] sm:$0xc0] %vm593_vm9, %v701_v26  ;;  %v654_v22 = vsel %vm335_vm5, %v646_v10, %v648_v21  ;;  %v573_v44 = vpop.permute.xlu0 %572  ;;  %v837_v10 = vld [vmem:[#allocation2 + $0x108] sm:$0x3f] }
 0x30d   :  { %721 = vst.msk [vmem:[#allocation2 + $0xc0] sm:$0xf] %vm599_vm10, %v701_v26  ;;  %v580_v28 = vsel %vm145_vm1, %v571_v8, %v573_v44  ;;  %v581_v23 = vsel %vm145_vm1, %v573_v44, %v2288_v17  ;;  %v820_v14 = vld [vmem:[#allocation2 + $0x80] sm:$0xff] }
 0x30e   :  { %663 = vst [vmem:[#allocation2 + $0x58] sm:$0xfc] %v654_v22 }
 0x30f   :  { %589 = vst [vmem:[#allocation2] sm:$0xc0] %v580_v28  ;;  %v825_v29 = vld [vmem:[#allocation2 + $0xa8] sm:$0xff] }
 0x310   :  { %590 = vst [vmem:[#allocation2 + $0x8] sm:$0xc0] %v581_v23  ;;  %v830_v33 = vld [vmem:[#allocation2 + $0xd0] sm:$0xff] }
 0x311   :  { %595 = vst [vmem:[#allocation2 + $0x28] sm:$0xf] %v580_v28  ;;  %907 = vmatpush.msra.mxu1 %v830_v33 }
 0x312   :  { %596 = vst [vmem:[#allocation2 + $0x30] sm:$0xf] %v581_v23 }
 0x313   :  { %908 = vmatpush.msra.mxu1 %v825_v29  ;;  %v652_v30 = vpop.permute.xlu2 %651  ;;  %v729_v52 = vpop.permute.xlu1 %728  ;;  %v823_v61 = vld [vmem:[#allocation2 + $0x98] sm:$0xff] }
 0x314   :  { %667 = vst.msk [vmem:[#allocation2 + $0x70] sm:$0xfc] %vm666_vm11, %v652_v30  ;;  %v735_v34 = vsel %vm732_vm3, %v727_v32, %v729_v52  ;;  %v736_v40 = vsel %vm732_vm3, %v729_v52, %v731_v56  ;;  %v611_v0 = vpop.permute.xlu0 %610 }
 0x315   :  { %909 = vmatpush.msra.mxu1 %v820_v14  ;;  %744 = vst [vmem:[#allocation2 + $0xb0] sm:$0xf0] %v735_v34  ;;  %v618_v59 = vsel %vm616_vm6, %v609_v16, %v611_v0 }
 0x316   :  { %745 = vst [vmem:[#allocation2 + $0xb8] sm:$0xf0] %v736_v40  ;;  %v804_v37 = vld [vmem:[#allocation2] sm:$0xff] }
 0x317   :  { %749 = vst [vmem:[#allocation2 + $0xd8] sm:$0x3] %v735_v34  ;;  %v805_v39 = vld [vmem:[#allocation2 + $0x8] sm:$0xff] }
 0x318   :  { %750 = vst [vmem:[#allocation2 + $0xe0] sm:$0x3] %v736_v40  ;;  %v809_v31 = vld [vmem:[#allocation2 + $0x28] sm:$0xff] }
 0x319   :  { %627 = vst [vmem:[#allocation2 + $0x30] sm:$0xf0] %v618_v59  ;;  %888 = vmatpush.msra.mxu2 %v809_v31 }
 0x31a   :  { %633 = vst [vmem:[#allocation2 + $0x58] sm:$0x3] %v618_v59 }
 0x31b   :  { %889 = vmatpush.msra.mxu2 %v804_v37  ;;  %v650_v46 = vpop.permute.xlu1 %649 }
 0x31c   :  { %v655_v11 = vsel %vm335_vm5, %v648_v21, %v650_v46  ;;  %v656_v42 = vsel %vm335_vm5, %v650_v46, %v652_v30  ;;  %v699_v49 = vpop.permute.xlu0 %698  ;;  %1668 = vmatmul.msk.f32.vlgmr.msra.gmra.mxu2 %vm851_vm12, %v2318_v51 }
 0x31d   :  { %1673 = vmatpush.msk.msrb.mxu2 %vm858_vm15, %v836_v41  ;;  %664 = vst [vmem:[#allocation2 + $0x60] sm:$0xfc] %v655_v11  ;;  %v705_v43 = vsel %vm702_vm4, %v697_v20, %v699_v49  ;;  %v706_v47 = vsel %vm702_vm4, %v699_v49, %v701_v26 }
 0x31e   :  { %665 = vst [vmem:[#allocation2 + $0x68] sm:$0xfc] %v656_v42  ;;  %v831_v58 = vld [vmem:[#allocation2 + $0xd8] sm:$0xff] }
 0x31f   :  { %714 = vst [vmem:[#allocation2 + $0x88] sm:$0xc0] %v705_v43  ;;  %930 = vmatpush.msrb.mxu2 %v831_v58 }
 0x320   :  { %715 = vst [vmem:[#allocation2 + $0x90] sm:$0xc0] %v706_v47  ;;  %v810_v57 = vld [vmem:[#allocation2 + $0x30] sm:$0xff] }
 0x321   :  { %719 = vst [vmem:[#allocation2 + $0xb0] sm:$0xf] %v705_v43  ;;  %v815_v60 = vld [vmem:[#allocation2 + $0x58] sm:$0xff] }
 0x322   :  { %720 = vst [vmem:[#allocation2 + $0xb8] sm:$0xf] %v706_v47  ;;  %910 = vmatpush.msra.mxu1 %v815_v60 }
 0x323   :  { %v577_v15 = vpop.permute.xlu1 %576 }
 0x324   :  { %911 = vmatpush.msra.mxu1 %v810_v57  ;;  %v582_v3 = vsel %vm145_vm1, %v2288_v17, %v577_v15  ;;  %v613_v18 = vpop.permute.xlu0 %612  ;;  %1669 = vmatmul.msk.f32.gmra.mxu2 %vm851_vm12, %v2327_v55 }
 0x325   :  { %591 = vst [vmem:[#allocation2 + $0x10] sm:$0xc0] %v582_v3  ;;  %v619_v48 = vsel %vm616_vm6, %v611_v0, %v613_v18 }
 0x326   :  { %912 = vmatpush.msra.mxu1 %v805_v39  ;;  %597 = vst [vmem:[#allocation2 + $0x38] sm:$0xf] %v582_v3  ;;  %v821_v7 = vld [vmem:[#allocation2 + $0x88] sm:$0xff] }
 0x327   :  { %1671 = vmatmul.msk.f32.vlgmr.msra.gmra.mxu1 %vm851_vm12, %v2318_v51  ;;  %628 = vst [vmem:[#allocation2 + $0x38] sm:$0xf0] %v619_v48  ;;  %v822_v5 = vld [vmem:[#allocation2 + $0x90] sm:$0xff] }
 0x328   :  { %1676 = vmatpush.msk.msrb.mxu1 %vm858_vm15, %v837_v10  ;;  %634 = vst [vmem:[#allocation2 + $0x60] sm:$0x3] %v619_v48  ;;  %v826_v4 = vld [vmem:[#allocation2 + $0xb0] sm:$0xff] }
 0x329   :  { %931 = vmatpush.msrb.mxu2 %v826_v4  ;;  %v827_v63 = vld [vmem:[#allocation2 + $0xb8] sm:$0xff] }
 0x32b   :  { %932 = vmatpush.msrb.mxu2 %v821_v7  ;;  %v615_v53 = vpop.permute.xlu1 %614 }
 0x32c   :  { %v620_v45 = vsel %vm616_vm6, %v613_v18, %v615_v53  ;;  %631 = vst.msk [vmem:[#allocation2 + $0x48] sm:$0xf0] %vm630_vm7, %v615_v53  ;;  %v761_v8 = vpop.permute.xlu0 %760  ;;  %v806_v17 = vld [vmem:[#allocation2 + $0x10] sm:$0xff] }
 0x32d   :  { %629 = vst [vmem:[#allocation2 + $0x40] sm:$0xf0] %v620_v45  ;;  %v766_v13 = vsel %vm762_vm2, %v2292_v19, %v761_v8  ;;  %v828_v19 = vld [vmem:[#allocation2 + $0xc0] sm:$0xff] }
 0x32e   :  { %635 = vst [vmem:[#allocation2 + $0x68] sm:$0x3] %v620_v45  ;;  %v811_v9 = vld [vmem:[#allocation2 + $0x38] sm:$0xff] }
 0x32f   :  { %637 = vst.msk [vmem:[#allocation2 + $0x70] sm:$0x3] %vm636_vm8, %v615_v53  ;;  %v816_v12 = vld [vmem:[#allocation2 + $0x60] sm:$0xff]  ;;  %1672 = vmatmul.msk.f32.gmra.mxu1 %vm851_vm12, %v2327_v55 }
 0x330   :  { %775 = vst [vmem:[#allocation2 + $0xe0] sm:$0xfc] %v766_v13  ;;  %933 = vmatpush.msrb.mxu2 %v816_v12 }
 0x331   :  { %776 = vst.msk [vmem:[#allocation2 + $0xe8] sm:$0xfc] %vm666_vm11, %v761_v8 }
 0x332   :  { %934 = vmatpush.msrb.mxu2 %v811_v9 }
 0x334   :  { %935 = vmatpush.msrb.mxu2 %v806_v17  ;;  %v579_v50 = vpop.permute.xlu0 %578 }
 0x335   :  { %v583_v54 = vsel %vm145_vm1, %v577_v15, %v579_v50  ;;  %594 = vst.msk [vmem:[#allocation2 + $0x20] sm:$0xc0] %vm593_vm9, %v579_v50  ;;  %1674 = vmatmul.msk.f32.vlgmr.msrb.gmra.mxu2 %vm851_vm12, %v2318_v51  ;;  %v817_v16 = vld [vmem:[#allocation2 + $0x68] sm:$0xff] }
 0x336   :  { %592 = vst [vmem:[#allocation2 + $0x18] sm:$0xc0] %v583_v54  ;;  %v818_v1 = vld [vmem:[#allocation2 + $0x70] sm:$0xff] }
 0x337   :  { %598 = vst [vmem:[#allocation2 + $0x40] sm:$0xf] %v583_v54  ;;  %v832_v62 = vld [vmem:[#allocation2 + $0xe0] sm:$0xff] }
 0x338   :  { %600 = vst.msk [vmem:[#allocation2 + $0x48] sm:$0xf] %vm599_vm10, %v579_v50  ;;  %v833_v35 = vld [vmem:[#allocation2 + $0xe8] sm:$0xff]  ;;  %953 = vmatpush.msrb.mxu1 %v832_v62 }
 0x339   :  { %976 = vmatpush.msra.mxu0 %v833_v35  ;;  %v844_v25 = vpop.permute.xlu2 %843 }
 0x33a   :  { %954 = vmatpush.msrb.mxu1 %v827_v63 }
 0x33b   :  { %977 = vmatpush.msra.mxu0 %v828_v19 }
 0x33c   :  { %955 = vmatpush.msrb.mxu1 %v822_v5  ;;  %v808_v20 = vld [vmem:[#allocation2 + $0x20] sm:$0xff] }
 0x33d   :  { %978 = vmatpush.msra.mxu0 %v823_v61  ;;  %1675 = vmatmul.msk.f32.gmra.mxu2 %vm851_vm12, %v2327_v55  ;;  %v807_v56 = vld [vmem:[#allocation2 + $0x18] sm:$0xff] }
 0x33e   :  { %956 = vmatpush.msrb.mxu1 %v817_v16  ;;  %v812_v24 = vld [vmem:[#allocation2 + $0x40] sm:$0xff] }
 0x33f   :  { %979 = vmatpush.msra.mxu0 %v818_v1  ;;  %v813_v27 = vld [vmem:[#allocation2 + $0x48] sm:$0xff] }
 0x340   :  { %957 = vmatpush.msrb.mxu1 %v812_v24 }
 0x341   :  { %980 = vmatpush.msra.mxu0 %v813_v27 }
 0x342   :  { %958 = vmatpush.msrb.mxu1 %v807_v56 }
 0x343   :  { %981 = vmatpush.msra.mxu0 %v808_v20  ;;  %1677 = vmatmul.msk.f32.vlgmr.msrb.gmra.mxu1 %vm851_vm12, %v2318_v51 }
 0x344   :  { %1680 = vmatmul.msk.f32.vlgmr.msra.gmra.mxu0 %vm851_vm12, %v2318_v51 }
 0x34b   :  { %1678 = vmatmul.msk.f32.gmra.mxu1 %vm851_vm12, %v2327_v55 }
 0x34c   :  { %1681 = vmatmul.msk.f32.gmra.mxu0 %vm851_vm12, %v2327_v55  ;;  %vm1139_vm12 = vcmask 855040  }
 0x377   :  { %v849_v40 = vpop.permute.xlu1 %848 }
 0x39f   :  { %v891_v32 = vpop.f32.mrf.mxu2 }
 0x3a0   :  { %v892_v38 = vadd.f32 %v891_v32, %v844_v25 }
 0x3a2   :  { %v999_v6 = vmul.f32 0.01, %v892_v38  ;;  %vm989_vm13 = vcmp.ge.f32.partialorder %v892_v38, 0.0 }
 0x3a4   :  { %v914_v26 = vpop.f32.mrf.mxu1  ;;  %v2366_v22 = vsel %vm989_vm13, %v892_v38, %v999_v6  ;;  %vm1145_vm13 = vcmask 1043456  }
 0x3a5   :  { %v915_v21 = vadd.f32 %v914_v26, %v844_v25  ;;  %1027 = vrot.lane.b32.xlu2 %v2366_v22, %s1775_s0 }
 0x3a7   :  { %v1000_v44 = vmul.f32 0.01, %v915_v21  ;;  %vm990_vm14 = vcmp.ge.f32.partialorder %v915_v21, 0.0  ;;  %v894_v33 = vpop.f32.mrf.mxu2 }
 0x3a8   :  { %v895_v37 = vadd.f32 %v894_v33, %v849_v40 }
 0x3a9   :  { %v2370_v28 = vsel %vm990_vm14, %v915_v21, %v1000_v44  ;;  %vm1335_vm14 = vcmask 195584  }
 0x3aa   :  { %1029 = vrot.lane.b32.xlu1 %v2370_v28, %s1775_s0  ;;  %v1004_v51 = vmul.f32 0.01, %v895_v37  ;;  %vm994_vm4 = vcmp.ge.f32.partialorder %v895_v37, 0.0 }
 0x3ac   :  { %v917_v23 = vpop.f32.mrf.mxu1  ;;  %v1014_v57 = vsel %vm994_vm4, %v895_v37, %v1004_v51  ;;  %vm1310_vm4 = vcmask 228352  }
 0x3ad   :  { %v918_v15 = vadd.f32 %v917_v23, %v849_v40 }
 0x3af   :  { %v1005_v18 = vmul.f32 0.01, %v918_v15  ;;  %vm995_vm9 = vcmp.ge.f32.partialorder %v918_v15, 0.0 }
 0x3b1   :  { %v1015_v48 = vsel %vm995_vm9, %v918_v15, %v1005_v18 }
 0x3b8   :  { %v937_v46 = vpop.f32.mrf.mxu2 }
 0x3b9   :  { %v938_v60 = vadd.f32 %v937_v46, %v844_v25 }
 0x3bb   :  { %v1001_v3 = vmul.f32 0.01, %v938_v60  ;;  %vm991_vm10 = vcmp.ge.f32.partialorder %v938_v60, 0.0 }
 0x3bd   :  { %v1011_v10 = vsel %vm991_vm10, %v938_v60, %v1001_v3  ;;  %vm1445_vm10 = vcmask 15368  }
 0x3c0   :  { %v960_v29 = vpop.f32.mrf.mxu1  ;;  %v940_v36 = vpop.f32.mrf.mxu2 }
 0x3c1   :  { %v983_v30 = vpop.f32.mrf.mxu0  ;;  %v961_v52 = vadd.f32 %v960_v29, %v844_v25  ;;  %v941_v39 = vadd.f32 %v940_v36, %v849_v40 }
 0x3c2   :  { %v984_v14 = vadd.f32 %v983_v30, %v844_v25 }
 0x3c3   :  { %v1002_v34 = vmul.f32 0.01, %v961_v52  ;;  %vm992_vm15 = vcmp.ge.f32.partialorder %v961_v52, 0.0  ;;  %v1006_v4 = vmul.f32 0.01, %v941_v39  ;;  %vm996_vm11 = vcmp.ge.f32.partialorder %v941_v39, 0.0 }
 0x3c4   :  { %v1003_v0 = vmul.f32 0.01, %v984_v14  ;;  %vm993_vm2 = vcmp.ge.f32.partialorder %v984_v14, 0.0 }
 0x3c5   :  { %v2374_v59 = vsel %vm992_vm15, %v961_v52, %v1002_v34  ;;  %v1016_v7 = vsel %vm996_vm11, %v941_v39, %v1006_v4  ;;  %vm1282_vm15 = vcmask 261120   ;;  %vm1450_vm11 = vcmask 23568  }
 0x3c6   :  { %v1013_v31 = vsel %vm993_vm2, %v984_v14, %v1003_v0  ;;  %1033 = vrot.lane.b32.xlu1 %v2374_v59, %s1775_s0  ;;  %vm1167_vm2 = vcmask 859140  }
 0x3c7   :  { %1067 = vrot.lane.b32.xlu0 %v1013_v31, %s1775_s0 }
 0x3c8   :  { %v963_v41 = vpop.f32.mrf.mxu1 }
 0x3c9   :  { %v986_v11 = vpop.f32.mrf.mxu0  ;;  %v964_v42 = vadd.f32 %v963_v41, %v849_v40 }
 0x3ca   :  { %v987_v49 = vadd.f32 %v986_v11, %v849_v40 }
 0x3cb   :  { %v1007_v43 = vmul.f32 0.01, %v964_v42  ;;  %vm997_vm7 = vcmp.ge.f32.partialorder %v964_v42, 0.0 }
 0x3cc   :  { %v1008_v47 = vmul.f32 0.01, %v987_v49  ;;  %vm998_vm8 = vcmp.ge.f32.partialorder %v987_v49, 0.0 }
 0x3cd   :  { %v2379_v58 = vsel %vm997_vm7, %v964_v42, %v1007_v43  ;;  %vm1255_vm7 = vcmask 64512  }
 0x3ce   :  { %v1018_v55 = vsel %vm998_vm8, %v987_v49, %v1008_v47  ;;  %1041 = vrot.lane.b32.xlu1 %v2379_v58, %s1775_s0  ;;  %vm1179_vm8 = vcmask 982016  }
 0x3cf   :  { %1069 = vrot.lane.b32.xlu2 %v1018_v55, %s1775_s0  ;;  %1035 = vrot.lane.b32.xlu0 %v1014_v57, %s1775_s0 }
 0x3d7   :  { %1037 = vrot.lane.b32.xlu2 %v1015_v48, %s1775_s0  ;;  %1031 = vrot.lane.b32.xlu0 %v1011_v10, %s1775_s0 }
 0x3df   :  { %1039 = vrot.lane.b32.xlu0 %v1016_v7, %s1775_s0  ;;  %s1788_s0 = smov 28  }
 0x3ff   :  { %v1028_v53 = vpop.permute.xlu2 %1027 }
 0x41c   :  { %v1030_v45 = vpop.permute.xlu1 %1029 }
 0x41d   :  { %v1043_v19 = vsel %vm145_vm1, %v1028_v53, %v1030_v45 }
 0x41e   :  { %v1057_v61 = vmax.f32 %v2366_v22, %v1043_v19 }
 0x429   :  { %v1070_v8 = vpop.permute.xlu2 %1069 }
 0x42a   :  { %v1080_v62 = vmax.f32 %v1018_v55, %v1070_v8 }
 0x431   :  { %v1038_v50 = vpop.permute.xlu2 %1037 }
 0x438   :  { %v1034_v2 = vpop.permute.xlu1 %1033 }
 0x439   :  { %v1068_v13 = vpop.permute.xlu0 %1067  ;;  %v1060_v22 = vmax.f32 %v2374_v59, %v1034_v2 }
 0x43a   :  { %v1078_v12 = vmax.f32 %v1013_v31, %v1068_v13  ;;  %v1071_v9 = vsel %vm145_vm1, %v1034_v2, %v1068_v13 }
 0x43b   :  { %v1077_v17 = vmax.f32 %v2374_v59, %v1071_v9 }
 0x43c   :  { %1099 = vrot.lane.b32.xlu0 %v1078_v12, %s1779_s15 }
 0x43d   :  { %1097 = vrot.lane.b32.xlu2 %v1077_v17, %s1779_s15 }
 0x440   :  { %v1042_v56 = vpop.permute.xlu1 %1041 }
 0x441   :  { %v1036_v54 = vpop.permute.xlu0 %1035  ;;  %v1072_v20 = vsel %vm145_vm1, %v1042_v56, %v1070_v8  ;;  %v1064_v49 = vmax.f32 %v2379_v58, %v1042_v56 }
 0x442   :  { %v1046_v35 = vsel %vm145_vm1, %v1036_v54, %v1038_v50  ;;  %v1079_v6 = vmax.f32 %v2379_v58, %v1072_v20 }
 0x443   :  { %v2393_v63 = vmax.f32 %v1014_v57, %v1046_v35 }
 0x444   :  { %1109 = vrot.lane.b32.xlu0 %v1080_v62, %s1779_s15 }
 0x445   :  { %1101 = vrot.lane.b32.xlu1 %v2393_v63, %s1779_s15 }
 0x449   :  { %v1032_v5 = vpop.permute.xlu0 %1031 }
 0x44a   :  { %v1044_v16 = vsel %vm145_vm1, %v1030_v45, %v1032_v5  ;;  %v1045_v1 = vsel %vm145_vm1, %v1032_v5, %v1034_v2 }
 0x44b   :  { %v1058_v24 = vmax.f32 %v2370_v28, %v1044_v16  ;;  %v1059_v27 = vmax.f32 %v1011_v10, %v1045_v1 }
 0x44c   :  { %1091 = vrot.lane.b32.xlu0 %v1057_v61, %s1779_s15 }
 0x44d   :  { %1093 = vrot.lane.b32.xlu2 %v1058_v24, %s1779_s15  ;;  %1095 = vrot.lane.b32.xlu1 %v1059_v27, %s1779_s15 }
 0x451   :  { %v1040_v25 = vpop.permute.xlu0 %1039 }
 0x452   :  { %v1048_v32 = vsel %vm145_vm1, %v1040_v25, %v1042_v56  ;;  %v1047_v26 = vsel %vm145_vm1, %v1038_v50, %v1040_v25  ;;  %vm1136_vm1 = vcmask 859136  }
 0x453   :  { %v2408_v38 = vmax.f32 %v1016_v7, %v1048_v32  ;;  %v1062_v21 = vmax.f32 %v1015_v48, %v1047_v26 }
 0x455   :  { %1107 = vrot.lane.b32.xlu2 %v1079_v6, %s1779_s15  ;;  %1105 = vrot.lane.b32.xlu1 %v2408_v38, %s1779_s15 }
 0x45d   :  { %1103 = vrot.lane.b32.xlu1 %v1062_v21, %s1779_s15  ;;  %s1791_s15 = smov 120  }
 0x497   :  { %v1098_v44 = vpop.permute.xlu2 %1097 }
 0x4a7   :  { %v1094_v14 = vpop.permute.xlu2 %1093 }
 0x4ae   :  { %v1100_v28 = vpop.permute.xlu0 %1099 }
 0x4af   :  { %v1114_v23 = vsel %vm335_vm5, %v1098_v44, %v1100_v28  ;;  %v1108_v11 = vpop.permute.xlu2 %1107 }
 0x4b0   :  { %v1130_v33 = vmax.f32 %v1060_v22, %v1114_v23 }
 0x4b2   :  { %1327 = vrot.lane.b32.xlu0 %v1130_v33, %s1787_s4  ;;  %v1295_v29 = vrot.slane %v1130_v33, 4 }
 0x4b4   :  { %1302 = vrot.lane.b32.xlu2 %v1295_v29, %s1788_s0 }
 0x4b6   :  { %v1110_v30 = vpop.permute.xlu0 %1109 }
 0x4b7   :  { %v1102_v52 = vpop.permute.xlu1 %1101  ;;  %v1118_v42 = vsel %vm335_vm5, %v1108_v11, %v1110_v30 }
 0x4b8   :  { %v1134_v43 = vmax.f32 %v1064_v49, %v1118_v42 }
 0x4ba   :  { %1274 = vrot.lane.b32.xlu0 %v1130_v33, %s1789_s30  ;;  %v1296_v36 = vrot.slane %v1134_v43, 4 }
 0x4bc   :  { %v1297_v10 = vsel %vm1145_vm13, %v1295_v29, %v1296_v36 }
 0x4be   :  { %v1092_v34 = vpop.permute.xlu0 %1091 }
 0x4bf   :  { %v1111_v40 = vsel %vm335_vm5, %v1092_v34, %v1094_v14  ;;  %v1096_v0 = vpop.permute.xlu1 %1095 }
 0x4c0   :  { %v2422_v59 = vmax.f32 %v1057_v61, %v1111_v40  ;;  %v1112_v31 = vsel %vm335_vm5, %v1094_v14, %v1096_v0  ;;  %v1113_v37 = vsel %vm335_vm5, %v1096_v0, %v1098_v44 }
 0x4c1   :  { %v2426_v41 = vmax.f32 %v1058_v24, %v1112_v31  ;;  %v1129_v46 = vmax.f32 %v1059_v27, %v1113_v37 }
 0x4c2   :  { %v1146_v3 = vrot.slane %v2422_v59, 4 }
 0x4c3   :  { %1137 = vst.msk [vmem:[#allocation3 + $0x8] sm:$0xff] %vm1136_vm1, %v2426_v41  ;;  %1223 = vrot.lane.b32.xlu0 %v1129_v46, %s1782_s2  ;;  %1325 = vrot.lane.b32.xlu2 %v1129_v46, %s1787_s4  ;;  %v1192_v58 = vrot.slane %v1129_v46, 4  ;;  %v1147_v18 = vrot.slane %v2426_v41, 4 }
 0x4c4   :  { %1323 = vrot.lane.b32.xlu1 %v2426_v41, %s1787_s4 }
 0x4c7   :  { %v1106_v51 = vpop.permute.xlu1 %1105 }
 0x4c8   :  { %v1117_v39 = vsel %vm335_vm5, %v1106_v51, %v1108_v11 }
 0x4c9   :  { %v1133_v48 = vmax.f32 %v2408_v38, %v1117_v39 }
 0x4cb   :  { %1333 = vrot.lane.b32.xlu0 %v1134_v43, %s1787_s4  ;;  %1272 = vrot.lane.b32.xlu2 %v1129_v46, %s1789_s30  ;;  %v1193_v4 = vrot.slane %v1133_v48, 4 }
 0x4cc   :  { %1270 = vrot.lane.b32.xlu1 %v2426_v41, %s1789_s30 }
 0x4cd   :  { %v1194_v7 = vsel %vm1145_vm13, %v1192_v58, %v1193_v4 }
 0x4cf   :  { %v1104_v47 = vpop.permute.xlu1 %1103 }
 0x4d0   :  { %v1115_v60 = vsel %vm335_vm5, %v1102_v52, %v1104_v47  ;;  %v1116_v55 = vsel %vm335_vm5, %v1104_v47, %v1106_v51 }
 0x4d1   :  { %v1131_v57 = vmax.f32 %v2393_v63, %v1115_v60  ;;  %v1132_v15 = vmax.f32 %v1062_v21, %v1116_v55  ;;  %v1377_v63 = vld [vmem:[%s2695_s6] sm:$0xff] }
 0x4d3   :  { %1138 = vst [vmem:[#allocation3 + $0x10] sm:$0xf] %v1131_v57  ;;  %1280 = vrot.lane.b32.xlu0 %v1134_v43, %s1789_s30  ;;  %1221 = vrot.lane.b32.xlu2 %v2426_v41, %s1782_s2  ;;  %v1150_v53 = vrot.slane %v1132_v15, 4  ;;  %v1148_v2 = vrot.slane %v1131_v57, 4 }
 0x4d4   :  { %1219 = vrot.lane.b32.xlu1 %v2422_v59, %s1782_s2  ;;  %1140 = vst.msk [vmem:[#allocation3 + $0x18] sm:$0xf] %vm1139_vm12, %v1132_v15 }
 0x4d5   :  { %v1151_v45 = vsel %vm1145_vm13, %v1147_v18, %v1150_v53  ;;  %v1149_v13 = vsel %vm1145_vm13, %v1146_v3, %v1148_v2 }
 0x4db   :  { %1199 = vrot.lane.b32.xlu0 %v1192_v58, %s1783_s20  ;;  %1247 = vrot.lane.b32.xlu2 %v1192_v58, %s1790_s14 }
 0x4dc   :  { %1171 = vrot.lane.b32.xlu1 %v2422_v59, %s1791_s15 }
 0x4e3   :  { %1195 = vrot.lane.b32.xlu0 %v1146_v3, %s1783_s20  ;;  %1197 = vrot.lane.b32.xlu2 %v1147_v18, %s1783_s20 }
 0x4e4   :  { %1300 = vrot.lane.b32.xlu1 %v1192_v58, %s1788_s0 }
 0x4eb   :  { %1308 = vrot.lane.b32.xlu0 %v1297_v10, %s1788_s0  ;;  %1331 = vrot.lane.b32.xlu2 %v1133_v48, %s1787_s4 }
 0x4ec   :  { %1298 = vrot.lane.b32.xlu1 %v1147_v18, %s1788_s0 }
 0x4f3   :  { %1278 = vrot.lane.b32.xlu2 %v1133_v48, %s1789_s30  ;;  %1276 = vrot.lane.b32.xlu0 %v1132_v15, %s1789_s30 }
 0x4f4   :  { %1245 = vrot.lane.b32.xlu1 %v1147_v18, %s1790_s14 }
 0x4fb   :  { %1227 = vrot.lane.b32.xlu2 %v1132_v15, %s1782_s2  ;;  %1229 = vrot.lane.b32.xlu0 %v1133_v48, %s1782_s2 }
 0x4fc   :  { %1243 = vrot.lane.b32.xlu1 %v1146_v3, %s1790_s14 }
 0x503   :  { %1177 = vrot.lane.b32.xlu2 %v1132_v15, %s1791_s15  ;;  %1225 = vrot.lane.b32.xlu0 %v1131_v57, %s1782_s2  ;;  %s1794_s2 = smov 125  }
 0x504   :  { %1329 = vrot.lane.b32.xlu1 %v1132_v15, %s1787_s4 }
 0x50b   :  { %1306 = vrot.lane.b32.xlu2 %v1194_v7, %s1788_s0  ;;  %1253 = vrot.lane.b32.xlu0 %v1194_v7, %s1790_s14 }
 0x50c   :  { %1175 = vrot.lane.b32.xlu1 %v1131_v57, %s1791_s15 }
 0x50e   :  { %v1303_v8 = vpop.permute.xlu2 %1302 }
 0x513   :  { %1251 = vrot.lane.b32.xlu2 %v1151_v45, %s1790_s14  ;;  %1205 = vrot.lane.b32.xlu0 %v1194_v7, %s1783_s20 }
 0x514   :  { %1304 = vrot.lane.b32.xlu1 %v1151_v45, %s1788_s0 }
 0x51b   :  { %1203 = vrot.lane.b32.xlu2 %v1151_v45, %s1783_s20  ;;  %1156 = vrot.lane.b32.xlu0 %v1149_v13, %s1786_s23 }
 0x51c   :  { %1249 = vrot.lane.b32.xlu1 %v1149_v13, %s1790_s14 }
 0x51d   :  { %v1326_v12 = vpop.permute.xlu2 %1325 }
 0x523   :  { %1173 = vrot.lane.b32.xlu2 %v2426_v41, %s1791_s15  ;;  %1154 = vrot.lane.b32.xlu0 %v1147_v18, %s1786_s23 }
 0x524   :  { %1201 = vrot.lane.b32.xlu1 %v1149_v13, %s1783_s20  ;;  %v1328_v9 = vpop.permute.xlu0 %1327 }
 0x525   :  { %v1337_v17 = vsel %vm1335_vm14, %v1326_v12, %v1328_v9  ;;  %v1273_v50 = vpop.permute.xlu2 %1272 }
 0x526   :  { %1345 = vst.msk [vmem:[#allocation3 + $0xc8] sm:$0xff] %vm1136_vm1, %v1337_v17 }
 0x52b   :  { %1152 = vrot.lane.b32.xlu2 %v1146_v3, %s1786_s23 }
 0x52c   :  { %1158 = vrot.lane.b32.xlu1 %v1151_v45, %s1786_s23  ;;  %v1275_v54 = vpop.permute.xlu0 %1274  ;;  %s1797_s23 = smov 35  }
 0x52d   :  { %v1284_v62 = vsel %vm1282_vm15, %v1273_v50, %v1275_v54  ;;  %v1222_v35 = vpop.permute.xlu2 %1221  ;;  %v1374_v29 = vld [vmem:[#allocation3 + $0xc8] sm:$0xff] }
 0x52e   :  { %1292 = vst.msk [vmem:[#allocation3 + $0x98] sm:$0xff] %vm1136_vm1, %v1284_v62 }
 0x534   :  { %1380 = vperm.xlu1 %1737, %v1377_v63  }
 0x535   :  { %v1224_v19 = vpop.permute.xlu0 %1223  ;;  %v1248_v5 = vpop.permute.xlu2 %1247  ;;  %v1368_v18 = vld [vmem:[#allocation3 + $0x98] sm:$0xff] }
 0x536   :  { %v1232_v61 = vsel %vm787_vm0, %v1222_v35, %v1224_v19  ;;  %v1324_v16 = vpop.permute.xlu1 %1323 }
 0x537   :  { %1240 = vst.msk [vmem:[#allocation3 + $0x68] sm:$0xff] %vm1136_vm1, %v1232_v61  ;;  %v2501_v1 = vsel %vm1335_vm14, %v1324_v16, %v1326_v12 }
 0x53d   :  { %v1334_v24 = vpop.permute.xlu0 %1333  ;;  %v1198_v27 = vpop.permute.xlu2 %1197 }
 0x53e   :  { %v1271_v56 = vpop.permute.xlu1 %1270  ;;  %v1362_v19 = vld [vmem:[#allocation3 + $0x68] sm:$0xff] }
 0x53f   :  { %v2504_v20 = vsel %vm1282_vm15, %v1271_v56, %v1273_v50 }
 0x545   :  { %v1281_v25 = vpop.permute.xlu0 %1280  ;;  %v1332_v32 = vpop.permute.xlu2 %1331 }
 0x546   :  { %v1339_v38 = vsel %vm1335_vm14, %v1332_v32, %v1334_v24  ;;  %v1220_v6 = vpop.permute.xlu1 %1219 }
 0x547   :  { %1347 = vst.msk [vmem:[#allocation3 + $0xd8] sm:$0xf] %vm1139_vm12, %v1339_v38  ;;  %v2509_v26 = vsel %vm787_vm0, %v1220_v6, %v1222_v35 }
 0x54d   :  { %v1200_v21 = vpop.permute.xlu0 %1199  ;;  %v1279_v22 = vpop.permute.xlu2 %1278 }
 0x54e   :  { %v1208_v44 = vsel %vm732_vm3, %v1198_v27, %v1200_v21  ;;  %v1286_v28 = vsel %vm1282_vm15, %v1279_v22, %v1281_v25  ;;  %v1172_v23 = vpop.permute.xlu1 %1171  ;;  %v1376_v33 = vld [vmem:[#allocation3 + $0xd8] sm:$0xf] }
 0x54f   :  { %1216 = vst.msk [vmem:[#allocation3 + $0x48] sm:$0xf0] %vm1167_vm2, %v1208_v44  ;;  %1684 = vmatpush.msk.msra.mxu2 %vm1145_vm13, %v1376_v33 }
 0x550   :  { %1294 = vst.msk [vmem:[#allocation3 + $0xa8] sm:$0xf] %vm1139_vm12, %v1286_v28  ;;  %v1348_v28 = vld [vmem:[%s2694_s5] sm:$0xff]  ;;  %s1793_s5 = smov 122  }
 0x551   :  { %1416 = vmatpush.msra.mxu2 %v1374_v29  ;;  %v1350_v29 = vld [vmem:[#allocation3 + $0x8] sm:$0xff] }
 0x555   :  { %v1196_v30 = vpop.permute.xlu0 %1195  ;;  %v1228_v52 = vpop.permute.xlu2 %1227 }
 0x556   :  { %v1207_v14 = vsel %vm732_vm3, %v1196_v30, %v1198_v27  ;;  %v1301_v34 = vpop.permute.xlu1 %1300 }
 0x557   :  { %1215 = vst [vmem:[#allocation3 + $0x40] sm:$0xf0] %v1207_v14  ;;  %v1312_v40 = vsel %vm1310_vm4, %v1301_v34, %v1303_v8 }
 0x558   :  { %1320 = vst.msk [vmem:[#allocation3 + $0xa8] sm:$0xf0] %vm1167_vm2, %v1312_v40 }
 0x55d   :  { %v1309_v0 = vpop.permute.xlu0 %1308  ;;  %v1178_v31 = vpop.permute.xlu2 %1177 }
 0x55e   :  { %1189 = vst.msk [vmem:[#allocation3 + $0x48] sm:$0xf] %vm1139_vm12, %v1178_v31  ;;  %v1299_v37 = vpop.permute.xlu1 %1298 }
 0x55f   :  { %v1311_v41 = vsel %vm1310_vm4, %v1299_v37, %v1301_v34  ;;  %v1370_v3 = vld [vmem:[#allocation3 + $0xa8] sm:$0xff] }
 0x560   :  { %1319 = vst [vmem:[#allocation3 + $0xa0] sm:$0xf0] %v1311_v41 }
 0x565   :  { %v1307_v46 = vpop.permute.xlu2 %1306  ;;  %v1277_v11 = vpop.permute.xlu0 %1276  ;;  %v1358_v24 = vld [vmem:[#allocation3 + $0x48] sm:$0xff] }
 0x566   :  { %v1314_v42 = vsel %vm1310_vm4, %v1307_v46, %v1309_v0  ;;  %v1285_v49 = vsel %vm1282_vm15, %v1277_v11, %v1279_v22  ;;  %v1246_v51 = vpop.permute.xlu1 %1245  ;;  %vm1476_vm15 = vcmask 64568  }
 0x567   :  { %1322 = vst.msk [vmem:[#allocation3 + $0xb8] sm:$0xff] %vm1136_vm1, %v1314_v42  ;;  %v1257_v43 = vsel %vm1255_vm7, %v1246_v51, %v1248_v5 }
 0x568   :  { %1293 = vst [vmem:[#allocation3 + $0xa0] sm:$0xf] %v1285_v49 }
 0x569   :  { %1265 = vst.msk [vmem:[#allocation3 + $0x78] sm:$0xf0] %vm1167_vm2, %v1257_v43 }
 0x56d   :  { %v1230_v47 = vpop.permute.xlu0 %1229  ;;  %v1252_v60 = vpop.permute.xlu2 %1251 }
 0x56e   :  { %v1234_v55 = vsel %vm787_vm0, %v1228_v52, %v1230_v47  ;;  %v1244_v57 = vpop.permute.xlu1 %1243  ;;  %v1372_v15 = vld [vmem:[#allocation3 + $0xb8] sm:$0xff] }
 0x56f   :  { %1242 = vst.msk [vmem:[#allocation3 + $0x78] sm:$0xf] %vm1139_vm12, %v1234_v55  ;;  %v1256_v58 = vsel %vm1255_vm7, %v1244_v57, %v1246_v51  ;;  %1417 = vmatpush.msra.mxu2 %v1372_v15  ;;  %v1369_v63 = vld [vmem:[#allocation3 + $0xa0] sm:$0xff]  ;;  %vm1460_vm12 = vcmask 39968  }
 0x570   :  { %1264 = vst [vmem:[#allocation3 + $0x70] sm:$0xf0] %v1256_v58 }
 0x571   :  { %1418 = vmatpush.msra.mxu2 %v1370_v3 }
 0x573   :  { %1419 = vmatpush.msra.mxu2 %v1368_v18 }
 0x575   :  { %v1204_v36 = vpop.permute.xlu2 %1203  ;;  %v1226_v39 = vpop.permute.xlu0 %1225 }
 0x576   :  { %v1233_v48 = vsel %vm787_vm0, %v1226_v39, %v1228_v52  ;;  %v1330_v10 = vpop.permute.xlu1 %1329  ;;  %v1364_v35 = vld [vmem:[#allocation3 + $0x78] sm:$0xff]  ;;  %vm1383_vm0 = vcmask 883712   ;;  %v1544_v39 = vld [vmem:[%s2696_s7 + $0x40] sm:$0xff] }
 0x577   :  { %1241 = vst [vmem:[#allocation3 + $0x70] sm:$0xf] %v1233_v48  ;;  %v1338_v4 = vsel %vm1335_vm14, %v1330_v10, %v1332_v32  ;;  %vm1471_vm14 = vcmask 56368   ;;  %1556 = vmatpush.msra.mxu3 %v1544_v39  ;;  %v1543_v48 = vld [vmem:[%s2696_s7 + $0x38] sm:$0xff]  ;;  %v1542_v10 = vld [vmem:[%s2696_s7 + $0x30] sm:$0xff] }
 0x578   :  { %1346 = vst [vmem:[#allocation3 + $0xd0] sm:$0xf] %v1338_v4  ;;  %v1541_v4 = vld [vmem:[%s2696_s7 + $0x28] sm:$0xff] }
 0x579   :  { %1557 = vmatpush.msra.mxu3 %v1543_v48 }
 0x57b   :  { %1558 = vmatpush.msra.mxu3 %v1542_v10 }
 0x57d   :  { %v1174_v7 = vpop.permute.xlu2 %1173  ;;  %v1254_v53 = vpop.permute.xlu0 %1253  ;;  %1559 = vmatpush.msra.mxu3 %v1541_v4 }
 0x57e   :  { %v1180_v45 = vsel %vm1179_vm8, %v1172_v23, %v1174_v7  ;;  %1187 = vst.msk [vmem:[#allocation3 + $0x38] sm:$0xff] %vm1136_vm1, %v1174_v7  ;;  %v1259_v8 = vsel %vm1255_vm7, %v1252_v60, %v1254_v53  ;;  %v1176_v2 = vpop.permute.xlu1 %1175  ;;  %v1363_v27 = vld [vmem:[#allocation3 + $0x70] sm:$0xff]  ;;  %v1540_v7 = vld [vmem:[%s2696_s7 + $0x20] sm:$0xff]  ;;  %v1539_v53 = vld [vmem:[%s2696_s7 + $0x18] sm:$0xff] }
 0x57f   :  { %v1181_v13 = vsel %vm1179_vm8, %v1176_v2, %v1178_v31  ;;  %v1375_v12 = vld [vmem:[#allocation3 + $0xd0] sm:$0xf]  ;;  %1267 = vst.msk [vmem:[#allocation3 + $0x88] sm:$0xff] %vm1136_vm1, %v1259_v8  ;;  %1560 = vmatpush.msra.mxu3 %v1540_v7  ;;  %v1536_v2 = vld [vmem:[%s2696_s7] sm:$0xff]  ;;  %vm1498_vm8 = vcmask 213136  }
 0x580   :  { %1682 = vmatpush.msk.msra.mxu1 %vm1145_vm13, %v1375_v12  ;;  %1188 = vst [vmem:[#allocation3 + $0x40] sm:$0xf] %v1181_v13  ;;  %vm1465_vm13 = vcmask 48168   ;;  %v1537_v8 = vld [vmem:[%s2696_s7 + $0x8] sm:$0xff]  ;;  %v1587_v13 = vld [vmem:[%s2698_s9 + $0x78] sm:$0xff]  ;;  %v1586_v12 = vld [vmem:[%s2698_s9 + $0x70] sm:$0xff] }
 0x581   :  { %1561 = vmatpush.msra.mxu3 %v1539_v53  ;;  %1589 = vmatpush.msrb.mxu0 %v1587_v13 }
 0x582   :  { %1396 = vmatpush.msra.mxu1 %v2501_v1 }
 0x583   :  { %1590 = vmatpush.msrb.mxu0 %v1586_v12 }
 0x585   :  { %v1206_v9 = vpop.permute.xlu0 %1205  ;;  %v1356_v56 = vld [vmem:[#allocation3 + $0x38] sm:$0xff]  ;;  %v1153_v25 = vpop.permute.xlu2 %1152 }
 0x586   :  { %v1210_v17 = vsel %vm732_vm3, %v1204_v36, %v1206_v9  ;;  %v1305_v50 = vpop.permute.xlu1 %1304  ;;  %v1366_v62 = vld [vmem:[#allocation3 + $0x88] sm:$0xff]  ;;  %v1585_v9 = vld [vmem:[%s2698_s9 + $0x68] sm:$0xff] }
 0x587   :  { %1218 = vst.msk [vmem:[#allocation3 + $0x58] sm:$0xff] %vm1136_vm1, %v1210_v17  ;;  %v1313_v54 = vsel %vm1310_vm4, %v1305_v50, %v1307_v46  ;;  %1420 = vmatpush.msra.mxu2 %v1366_v62  ;;  %v1357_v21 = vld [vmem:[#allocation3 + $0x40] sm:$0xff]  ;;  %vm1484_vm4 = vcmask 65536   ;;  %v1584_v17 = vld [vmem:[%s2698_s9 + $0x60] sm:$0xff]  ;;  %1591 = vmatpush.msrb.mxu0 %v1585_v9 }
 0x588   :  { %1397 = vmatpush.msra.mxu1 %v1313_v54  ;;  %v1583_v54 = vld [vmem:[%s2698_s9 + $0x58] sm:$0xff] }
 0x589   :  { %1421 = vmatpush.msra.mxu2 %v1364_v35  ;;  %1592 = vmatpush.msrb.mxu0 %v1584_v17 }
 0x58a   :  { %1398 = vmatpush.msra.mxu1 %v1369_v63  ;;  %v1582_v63 = vld [vmem:[%s2698_s9 + $0x50] sm:$0xff] }
 0x58b   :  { %1422 = vmatpush.msra.mxu2 %v1362_v19  ;;  %1593 = vmatpush.msrb.mxu0 %v1583_v54  ;;  %v1581_v19 = vld [vmem:[%s2698_s9 + $0x48] sm:$0xff] }
 0x58c   :  { %1399 = vmatpush.msra.mxu1 %v2504_v20 }
 0x58d   :  { %v1157_v5 = vpop.permute.xlu0 %1156  ;;  %1594 = vmatpush.msrb.mxu0 %v1582_v63 }
 0x58e   :  { %v1250_v61 = vpop.permute.xlu1 %1249  ;;  %v1360_v16 = vld [vmem:[#allocation3 + $0x58] sm:$0xff] }
 0x58f   :  { %v1258_v1 = vsel %vm1255_vm7, %v1250_v61, %v1252_v60  ;;  %1423 = vmatpush.msra.mxu2 %v1360_v16  ;;  %vm1491_vm7 = vcmask 139336   ;;  %1595 = vmatpush.msrb.mxu0 %v1581_v19  ;;  %v1579_v61 = vld [vmem:[%s2698_s9 + $0x38] sm:$0xff] }
 0x590   :  { %1400 = vmatpush.msra.mxu1 %v1258_v1 }
 0x591   :  { %1424 = vmatpush.msra.mxu2 %v1358_v24  ;;  %v1578_v24 = vld [vmem:[%s2698_s9 + $0x30] sm:$0xff] }
 0x592   :  { %1401 = vmatpush.msra.mxu1 %v1363_v27 }
 0x593   :  { %1425 = vmatpush.msra.mxu2 %v1356_v56  ;;  %v1577_v56 = vld [vmem:[%s2698_s9 + $0x28] sm:$0xff] }
 0x594   :  { %1402 = vmatpush.msra.mxu1 %v2509_v26 }
 0x595   :  { %v1155_v32 = vpop.permute.xlu0 %1154 }
 0x596   :  { %v1160_v38 = vsel %vm616_vm6, %v1153_v25, %v1155_v32  ;;  %1168 = vst.msk [vmem:[#allocation3 + $0x18] sm:$0xf0] %vm1167_vm2, %v1155_v32  ;;  %v1202_v20 = vpop.permute.xlu1 %1201  ;;  %vm1481_vm2 = vcmask 72768   ;;  %v1576_v25 = vld [vmem:[%s2698_s9 + $0x20] sm:$0xff]  ;;  %v1575_v32 = vld [vmem:[%s2698_s9 + $0x18] sm:$0xff] }
 0x597   :  { %1166 = vst [vmem:[#allocation3 + $0x10] sm:$0xf0] %v1160_v38  ;;  %v1209_v6 = vsel %vm732_vm3, %v1202_v20, %v1204_v36 }
 0x598   :  { %1403 = vmatpush.msra.mxu1 %v1209_v6  ;;  %v1574_v6 = vld [vmem:[%s2698_s9 + $0x10] sm:$0xff] }
 0x59a   :  { %1404 = vmatpush.msra.mxu1 %v1357_v21  ;;  %v1573_v21 = vld [vmem:[%s2698_s9 + $0x8] sm:$0xff] }
 0x59c   :  { %1405 = vmatpush.msra.mxu1 %v1180_v45  ;;  %v1538_v45 = vld [vmem:[%s2696_s7 + $0x10] sm:$0xff] }
 0x59d   :  { %v1352_v33 = vld [vmem:[#allocation3 + $0x18] sm:$0xff]  ;;  %1562 = vmatpush.msra.mxu3 %v1538_v45 }
 0x59e   :  { %v1159_v22 = vpop.permute.xlu1 %1158  ;;  %v1351_v26 = vld [vmem:[#allocation3 + $0x10] sm:$0xff] }
 0x59f   :  { %v1161_v44 = vsel %vm616_vm6, %v1157_v5, %v1159_v22  ;;  %1170 = vst.msk [vmem:[#allocation3 + $0x28] sm:$0xff] %vm1136_vm1, %v1159_v22  ;;  %vm1439_vm6 = vcmask 7168   ;;  %vm1455_vm1 = vcmask 31768   ;;  %1563 = vmatpush.msra.mxu3 %v1537_v8  ;;  %v1580_v5 = vld [vmem:[%s2698_s9 + $0x40] sm:$0xff] }
 0x5a0   :  { %1406 = vmatpush.msra.mxu1 %v1161_v44  ;;  %1596 = vmatpush.msrb.mxu0 %v1580_v5  ;;  %v1572_v22 = vld [vmem:[%s2698_s9] sm:$0xff]  ;;  %v1627_v44 = vld [vmem:[%s2700_s11 + $0x78] sm:$0xff] }
 0x5a1   :  { %1564 = vmatpush.msra.mxu3 %v1536_v2 }
 0x5a2   :  { %1407 = vmatpush.msra.mxu1 %v1351_v26  ;;  %1597 = vmatpush.msrb.mxu0 %v1579_v61  ;;  %v1626_v26 = vld [vmem:[%s2700_s11 + $0x70] sm:$0xff] }
 0x5a3   :  { %1629 = vmatpush.msrb.mxu3 %v1627_v44 }
 0x5a4   :  { %1408 = vmatpush.msra.mxu1 %v2422_v59  ;;  %1598 = vmatpush.msrb.mxu0 %v1578_v24 }
 0x5a5   :  { %1683 = vmatmul.msk.f32.vlgmr.msra.gmra.mxu1 %vm1383_vm0, %v1348_v28  ;;  %1630 = vmatpush.msrb.mxu3 %v1626_v26 }
 0x5a6   :  { %v1354_v23 = vld [vmem:[#allocation3 + $0x28] sm:$0xff]  ;;  %v1381_v30 = vpop.permute.xlu1 %1380  ;;  %1599 = vmatpush.msrb.mxu0 %v1577_v56 }
 0x5a7   :  { %1426 = vmatpush.msra.mxu2 %v1354_v23  ;;  %v1624_v23 = vld [vmem:[%s2700_s11 + $0x60] sm:$0xff] }
 0x5a8   :  { %1600 = vmatpush.msrb.mxu0 %v1576_v25 }
 0x5a9   :  { %1427 = vmatpush.msra.mxu2 %v1352_v33  ;;  %v1623_v33 = vld [vmem:[%s2700_s11 + $0x58] sm:$0xff] }
 0x5aa   :  { %1601 = vmatpush.msrb.mxu0 %v1575_v32 }
 0x5ab   :  { %1428 = vmatpush.msra.mxu2 %v1350_v29  ;;  %v1622_v29 = vld [vmem:[%s2700_s11 + $0x50] sm:$0xff] }
 0x5ac   :  { %1685 = vmatmul.msk.f32.vlgmr.msra.gmra.mxu2 %vm1383_vm0, %v1348_v28  ;;  %vm1505_vm0 = vcmask 286936   ;;  %1602 = vmatpush.msrb.mxu0 %v1574_v6  ;;  %v1625_v28 = vld [vmem:[%s2700_s11 + $0x68] sm:$0xff] }
 0x5ad   :  { %1631 = vmatpush.msrb.mxu3 %v1625_v28 }
 0x5ae   :  { %1603 = vmatpush.msrb.mxu0 %v1573_v21 }
 0x5af   :  { %1632 = vmatpush.msrb.mxu3 %v1624_v23 }
 0x5b0   :  { %1604 = vmatpush.msrb.mxu0 %v1572_v22 }
 0x5b1   :  { %1633 = vmatpush.msrb.mxu3 %v1623_v33 }
 0x5b3   :  { %1634 = vmatpush.msrb.mxu3 %v1622_v29 }
 0x622   :  { %v1410_v52 = vpop.f32.mrf.mxu1 }
 0x623   :  { %v1411_v14 = vadd.f32 %v1410_v52, %v1381_v30  ;;  %v1620_v52 = vld [vmem:[%s2700_s11 + $0x40] sm:$0xff] }
 0x625   :  { %vm1433_vm3 = vcmp.ge.f32.partialorder %v1411_v14, 0.0  ;;  %v1435_v34 = vmul.f32 0.01, %v1411_v14 }
 0x627   :  { %v1437_v40 = vsel %vm1433_vm3, %v1411_v14, %v1435_v34  ;;  %vm1512_vm3 = vcmask 360736   ;;  %v1619_v14 = vld [vmem:[%s2700_s11 + $0x38] sm:$0xff]  ;;  %v1618_v34 = vld [vmem:[%s2700_s11 + $0x30] sm:$0xff] }
 0x628   :  { %1452 = vrot.lane.b32.xlu1 %v1437_v40, %s1792_s19  ;;  %1447 = vrot.lane.b32.xlu0 %v1437_v40, %s1793_s5  ;;  %1440 = vst.msk [vmem:[#allocation4] sm:$0xff] %vm1439_vm6, %v1437_v40  ;;  %vm1519_vm6 = vcmask 434536   ;;  %s1656_s19 = sshll.u32 %s1805_s18, 4  ;;  %s1657_s19 = int_to_ptr.vmem [resolvable:$true] %s1656_s19 }
 0x629   :  { %1442 = vrot.lane.b32.xlu2 %v1437_v40, %s1794_s2  ;;  %s1658_s2 = sshll.u32 %s2702_s13, 4  ;;  %s1659_s2 = int_to_ptr.hbm [resolvable:$true] %s1658_s2 }
 0x62f   :  { %v1430_v59 = vpop.f32.mrf.mxu2 }
 0x630   :  { %v1431_v0 = vadd.f32 %v1430_v59, %v1381_v30  ;;  %1462 = vrot.lane.b32.xlu0 %v1437_v40, %s1795_s21  ;;  %v1621_v30 = vld [vmem:[%s2700_s11 + $0x48] sm:$0xff]  ;;  %v1616_v59 = vld [vmem:[%s2700_s11 + $0x20] sm:$0xff] }
 0x631   :  { %1457 = vrot.lane.b32.xlu2 %v1437_v40, %s1783_s20  ;;  %s1798_s20 = smov 27   ;;  %1635 = vmatpush.msrb.mxu3 %v1621_v30  ;;  %v1617_v40 = vld [vmem:[%s2700_s11 + $0x28] sm:$0xff] }
 0x632   :  { %vm1434_vm9 = vcmp.ge.f32.partialorder %v1431_v0, 0.0  ;;  %v1436_v31 = vmul.f32 0.01, %v1431_v0 }
 0x633   :  { %1636 = vmatpush.msrb.mxu3 %v1620_v52 }
 0x634   :  { %v1438_v37 = vsel %vm1434_vm9, %v1431_v0, %v1436_v31  ;;  %vm1526_vm9 = vcmask 508336   ;;  %v1615_v0 = vld [vmem:[%s2700_s11 + $0x18] sm:$0xff]  ;;  %v1545_v31 = vld [vmem:[%s2697_s8] sm:$0x1] }
 0x635   :  { %1468 = vrot.lane.b32.xlu1 %v1438_v37, %s1796_s22  ;;  %1637 = vmatpush.msrb.mxu3 %v1619_v14 }
 0x637   :  { %1638 = vmatpush.msrb.mxu3 %v1618_v34 }
 0x638   :  { %1478 = vrot.lane.b32.xlu0 %v1438_v37, %s1789_s30 }
 0x639   :  { %1473 = vrot.lane.b32.xlu2 %v1438_v37, %s1797_s23  ;;  %1639 = vmatpush.msrb.mxu3 %v1617_v40 }
 0x63b   :  { %1640 = vmatpush.msrb.mxu3 %v1616_v59 }
 0x63d   :  { %1641 = vmatpush.msrb.mxu3 %v1615_v0 }
 0x683   :  { %v1443_v41 = vpop.permute.xlu2 %1442 }
 0x684   :  { %1446 = vst.msk [vmem:[#allocation4] sm:$0xff] %vm1445_vm10, %v1443_v41  ;;  %vm1533_vm10 = vcmask 582136  }
 0x68b   :  { %v1458_v42 = vpop.permute.xlu2 %1457 }
 0x693   :  { %v1474_v43 = vpop.permute.xlu2 %1473 }
 0x69a   :  { %v1453_v46 = vpop.permute.xlu1 %1452  ;;  %v1448_v11 = vpop.permute.xlu0 %1447 }
 0x69b   :  { %1451 = vst.msk [vmem:[#allocation4] sm:$0xff] %vm1450_vm11, %v1448_v11 }
 0x69c   :  { %1456 = vst.msk [vmem:[#allocation4] sm:$0xff] %vm1455_vm1, %v1453_v46  ;;  %vm1649_vm1 = vcmask 73728  }
 0x69d   :  { %1461 = vst.msk [vmem:[#allocation4] sm:$0xff] %vm1460_vm12, %v1458_v42  ;;  %v1614_v42 = vld [vmem:[%s2700_s11 + $0x10] sm:$0xff] }
 0x69e   :  { %1642 = vmatpush.msrb.mxu3 %v1614_v42 }
 0x6a2   :  { %v1463_v49 = vpop.permute.xlu0 %1462 }
 0x6a3   :  { %1466 = vst.msk [vmem:[#allocation4] sm:$0xff] %vm1465_vm13, %v1463_v49  ;;  %v1613_v49 = vld [vmem:[%s2700_s11 + $0x8] sm:$0xff] }
 0x6a4   :  { %1643 = vmatpush.msrb.mxu3 %v1613_v49 }
 0x6a7   :  { %v1469_v51 = vpop.permute.xlu1 %1468 }
 0x6a8   :  { %1472 = vst.msk [vmem:[#allocation4] sm:$0xff] %vm1471_vm14, %v1469_v51  ;;  %v1612_v51 = vld [vmem:[%s2700_s11] sm:$0xff] }
 0x6a9   :  { %1477 = vst.msk [vmem:[#allocation4] sm:$0xff] %vm1476_vm15, %v1474_v43  ;;  %1644 = vmatpush.msrb.mxu3 %v1612_v51  ;;  %v1588_v43 = vld [vmem:[%s2699_s10] sm:$0x1] }
 0x6aa   :  { %v1479_v47 = vpop.permute.xlu0 %1478 }
 0x6ab   :  { %1482 = vst.msk [vmem:[#allocation4] sm:$0xff] %vm1481_vm2, %v1479_v47 }
 0x6b2   :  { %v1500_v60 = vld [vmem:[#allocation4 + $0x3] sm:$0x1]  ;;  %v1493_v55 = vld [vmem:[#allocation4 + $0x2] sm:$0x1]  ;;  %v1486_v57 = vld [vmem:[#allocation4 + $0x1] sm:$0x1] }
 0x6b3   :  { %1502 = vrot.lane.b32.xlu0 %v1500_v60, %s1798_s20  ;;  %1495 = vrot.lane.b32.xlu2 %v1493_v55, %s1799_s24  ;;  %v1483_v15 = vld [vmem:[#allocation4] sm:$0x1]  ;;  %v1521_v58 = vld [vmem:[#allocation4 + $0x6] sm:$0x1]  ;;  %v1514_v3 = vld [vmem:[#allocation4 + $0x5] sm:$0x1] }
 0x6b4   :  { %1488 = vrot.lane.b32.xlu1 %v1486_v57, %s1800_s25  ;;  %1485 = vst.msk [vmem:[#allocation5] sm:$0x1] %vm1484_vm4, %v1483_v15  ;;  %v1507_v18 = vld [vmem:[#allocation4 + $0x4] sm:$0x1]  ;;  %v1528_v36 = vld [vmem:[#allocation4 + $0x7] sm:$0x1] }
 0x6b5   :  { %v1628_v15 = vld [vmem:[%s2701_s12] sm:$0x1] }
 0x6bb   :  { %1523 = vrot.lane.b32.xlu0 %v1521_v58, %s1801_s26  ;;  %1516 = vrot.lane.b32.xlu2 %v1514_v3, %s1802_s1 }
 0x6bc   :  { %1509 = vrot.lane.b32.xlu1 %v1507_v18, %s1803_s27 }
 0x6c4   :  { %1530 = vrot.lane.b32.xlu1 %v1528_v36, %s1804_s28 }
 0x70d   :  { %v1496_v50 = vpop.permute.xlu2 %1495 }
 0x715   :  { %v1517_v1 = vpop.permute.xlu2 %1516 }
 0x725   :  { %v1503_v62 = vpop.permute.xlu0 %1502 }
 0x726   :  { %v1489_v35 = vpop.permute.xlu1 %1488 }
 0x727   :  { %1492 = vst.msk [vmem:[#allocation5] sm:$0x1] %vm1491_vm7, %v1489_v35 }
 0x728   :  { %1499 = vst.msk [vmem:[#allocation5] sm:$0x1] %vm1498_vm8, %v1496_v50 }
 0x729   :  { %1506 = vst.msk [vmem:[#allocation5] sm:$0x1] %vm1505_vm0, %v1503_v62 }
 0x72d   :  { %v1524_v27 = vpop.permute.xlu0 %1523 }
 0x72e   :  { %v1510_v16 = vpop.permute.xlu1 %1509 }
 0x72f   :  { %1513 = vst.msk [vmem:[#allocation5] sm:$0x1] %vm1512_vm3, %v1510_v16 }
 0x730   :  { %1520 = vst.msk [vmem:[#allocation5] sm:$0x1] %vm1519_vm6, %v1517_v1 }
 0x731   :  { %1527 = vst.msk [vmem:[#allocation5] sm:$0x1] %vm1526_vm9, %v1524_v27 }
 0x736   :  { %v1531_v38 = vpop.permute.xlu1 %1530 }
 0x737   :  { %1534 = vst.msk [vmem:[#allocation5] sm:$0x1] %vm1533_vm10, %v1531_v38 }
 0x73e   :  { %v1535_v20 = vld [vmem:[#allocation5] sm:$0x1] }
 0x73f   :  { %1686 = vmatmul.msk.f32.vlgmr.msra.gmra.mxu3 %vm335_vm5, %v1535_v20 }
 0x7c2   :  { %v1566_v37 = vpop.f32.mrf.mxu3 }
 0x7c3   :  { %v1567_v41 = vadd.f32 %v1566_v37, %v1545_v31 }
 0x7c5   :  { %v1570_v46 = vmul.f32 0.01, %v1567_v41  ;;  %vm1569_vm5 = vcmp.ge.f32.partialorder %v1567_v41, 0.0 }
 0x7c7   :  { %v1571_v11 = vsel %vm1569_vm5, %v1567_v41, %v1570_v46 }
 0x7c8   :  { %1605 = vmatmul.f32.vlgmr.msrb.gmra.mxu0 %v1571_v11 }
 0x845   :  { %v1606_v47 = vpop.f32.mrf.mxu0 }
 0x846   :  { %v1607_v60 = vadd.f32 %v1606_v47, %v1588_v43 }
 0x848   :  { %v1610_v55 = vmul.f32 0.01, %v1607_v60  ;;  %vm1609_vm11 = vcmp.ge.f32.partialorder %v1607_v60, 0.0 }
 0x84a   :  { %v1611_v57 = vsel %vm1609_vm11, %v1607_v60, %v1610_v55 }
 0x84b   :  { %1645 = vmatmul.f32.vlgmr.msrb.gmra.mxu3 %v1611_v57 }
 0x8ce   :  { %v1646_v58 = vpop.f32.mrf.mxu3 }
 0x8cf   :  { %v1647_v3 = vadd.f32 %v1646_v58, %v1628_v15 }
 0x8d1   :  { %1650 = vst.msk [vmem:[#allocation6] sm:$0x1] %vm1649_vm1, %v1647_v3 }
 0x8d2   :  { %1661 = dma.vmem_to_hbm [thread:$0]  %s1657_s19, 16, %s1659_s2, [#allocation7]  }
 0x8d3   :  { %1763 = dma.done.wait [#allocation7], 16  }
 0x8d4   :  { %1764 = vsyncadd [#allocation7], 4294967280 }
 0x8d5   :  { %1666 = vsyncpa [#allocation7], 1 }

</bundles_post_ra>
